<compile_context>
chip_gen: v5e
topology: v5e:2x2
jax: 0.10.0
libtpu: 0.0.40
codegen_flags: <defaults>
</compile_context>

<pallas_src>
import numpy as np

import jax
import jax.numpy as jnp
from jax import lax
from jax.experimental import pallas as pl
from jax.experimental.pallas import tpu as pltpu

_SELU_ALPHA = 1.6732632423543772
_SELU_SCALE = 1.0507009873554805


def _selu(x):
    return _SELU_SCALE * jnp.where(x > 0, x, _SELU_ALPHA * (jnp.exp(x) - 1.0))


def _out_len(L):
    return (L - 3) // 2 + 1


# ------------------- wrapper-side folded / selection matrices --------------- #

def _row_select_np(L, Lo):
    """(3, Lo, L) 0/1 matrices: S[t, lo, l] = 1 iff l == 2*lo + t (k=3, s=2 taps)."""
    s = np.zeros((3, Lo, L), np.float32)
    for t in range(3):
        for lo in range(Lo):
            s[t, lo, 2 * lo + t] = 1.0
    return s


def _lane_pool_select_np(L, Lo, C):
    """(3, L*C, Lo*C) 0/1 matrices selecting lane block (2*lo+t, c) -> (lo, c)."""
    m = np.zeros((3, L * C, Lo * C), np.float32)
    eye = np.eye(C, dtype=np.float32)
    for t in range(3):
        for lo in range(Lo):
            m[t, (2 * lo + t) * C:(2 * lo + t + 1) * C, lo * C:(lo + 1) * C] = eye
    return m


def _fold_conv_lane(w3, L, Lo):
    """Fold a 1-D conv (k=3, s=2) acting on the lane-fused (l, cin) axis into a
    single (L*Cin, Lo*Cout) matrix: M[(l,ci),(lo,co)] = w3[l-2lo, ci, co]."""
    _, cin, cout = w3.shape
    w2 = w3.reshape(3 * cin, cout)
    m = jnp.zeros((L * cin, Lo * cout), w3.dtype)
    for lo in range(Lo):
        m = m.at[2 * lo * cin:(2 * lo + 3) * cin, lo * cout:(lo + 1) * cout].set(w2)
    return m


# ------------------------------ Pallas kernel ------------------------------- #

def _reduction_kernel(x_ref, k1_ref, b1_ref, mw_ref, bw_ref,
                      sh_ref, kh_ref, bh_ref, sd_ref, kd_ref, bd_ref,
                      pw_ref, p1_ref, p2_ref, o_ref):
    f32 = jnp.float32
    x = x_ref[0]                                    # (D*H, W*Cin): rows=(d,h), lanes=(w,ci)

    # ---- tower2: 1x1 conv + SELU (pure lane-dim channel mix) ----
    v = _selu(jnp.dot(x, k1_ref[...], preferred_element_type=f32) + b1_ref[...])
    # ---- conv along W (k=3, s=2) folded into one matmul ----
    v = _selu(jnp.dot(v, mw_ref[...], preferred_element_type=f32) + bw_ref[...])
    # ---- conv along H: row-tap selection (left matmul) x channel mix (right) ----
    acc = None
    for t in range(3):
        tap = jnp.dot(sh_ref[t], v, preferred_element_type=f32)
        term = jnp.dot(tap, kh_ref[t], preferred_element_type=f32)
        acc = term if acc is None else acc + term
    v = _selu(acc + bh_ref[...])
    # ---- conv along D ----
    acc = None
    for t in range(3):
        tap = jnp.dot(sd_ref[t], v, preferred_element_type=f32)
        term = jnp.dot(tap, kd_ref[t], preferred_element_type=f32)
        acc = term if acc is None else acc + term
    v = _selu(acc + bd_ref[...])                    # (Do*Ho, Wo*Ct), rows=(do,ho)

    # ---- tower1: separable 3x3x3/s2 max pool = three 3-tap max stages ----
    u = None
    for t in range(3):                              # W taps (exact 0/1 selection)
        tap = jnp.dot(x, pw_ref[t], preferred_element_type=f32)
        u = tap if u is None else jnp.maximum(u, tap)
    u2 = None
    for t in range(3):                              # H taps
        tap = jnp.dot(sh_ref[t], u, preferred_element_type=f32)
        u2 = tap if u2 is None else jnp.maximum(u2, tap)
    u3 = None
    for t in range(3):                              # D taps
        tap = jnp.dot(sd_ref[t], u2, preferred_element_type=f32)
        u3 = tap if u3 is None else jnp.maximum(u3, tap)   # (Do*Ho, Wo*Cin)

    # ---- channel concat = sum of disjoint lane placements ----
    o_ref[0] = (jnp.dot(u3, p1_ref[...], preferred_element_type=f32) +
                jnp.dot(v, p2_ref[...], preferred_element_type=f32))


# ------------------------------ forward wrapper ------------------------------ #

def reduction_forward(x_ncdhw, params):
    N, Cin, D, H, W = x_ncdhw.shape
    Do, Ho, Wo = _out_len(D), _out_len(H), _out_len(W)
    Cb = params["w1"].shape[-1]
    Ct = params["ww"].shape[-1]
    Ctot = Cin + Ct
    f32 = jnp.float32

    # NCDHW -> NDHWC -> per-batch 2-D view: rows = (d, h), lanes = (w, c).
    x2 = jnp.transpose(x_ncdhw, (0, 2, 3, 4, 1)).reshape(N, D * H, W * Cin)

    # Param-dependent folded weights (tiny, built per call).
    K1 = jnp.kron(jnp.eye(W, dtype=f32), params["w1"])                 # (W*Cin, W*Cb)
    MW = _fold_conv_lane(params["ww"], W, Wo)                          # (W*Cb, Wo*Ct)
    KH = jnp.stack([jnp.kron(jnp.eye(Wo, dtype=f32), params["wh"][t]) for t in range(3)])
    KD = jnp.stack([jnp.kron(jnp.eye(Wo, dtype=f32), params["wd"][t]) for t in range(3)])
    b1r = jnp.tile(params["b1"], W)[None, :]
    bwr = jnp.tile(params["bw"], Wo)[None, :]
    bhr = jnp.tile(params["bh"], Wo)[None, :]
    bdr = jnp.tile(params["bd"], Wo)[None, :]

    # Shape-only 0/1 selection / placement matrices (numpy -> baked constants).
    sh = _row_select_np(H, Ho)
    sd = _row_select_np(D, Do)
    SH = jnp.asarray(np.stack([np.kron(np.eye(D, dtype=np.float32), sh[t]) for t in range(3)]))
    SD = jnp.asarray(np.stack([np.kron(sd[t], np.eye(Ho, dtype=np.float32)) for t in range(3)]))
    PW = jnp.asarray(_lane_pool_select_np(W, Wo, Cin))
    e1 = np.concatenate([np.eye(Cin, dtype=np.float32), np.zeros((Cin, Ct), np.float32)], axis=1)
    e2 = np.concatenate([np.zeros((Ct, Cin), np.float32), np.eye(Ct, dtype=np.float32)], axis=1)
    P1 = jnp.asarray(np.kron(np.eye(Wo, dtype=np.float32), e1))        # (Wo*Cin, Wo*Ctot)
    P2 = jnp.asarray(np.kron(np.eye(Wo, dtype=np.float32), e2))        # (Wo*Ct,  Wo*Ctot)

    out2d = pl.pallas_call(
        _reduction_kernel,
        out_shape=jax.ShapeDtypeStruct((N, Do * Ho, Wo * Ctot), f32),
        grid=(N,),
        in_specs=[
            pl.BlockSpec((1, D * H, W * Cin), lambda n: (n, 0, 0)),     # x view
            pl.BlockSpec((W * Cin, W * Cb), lambda n: (0, 0)),          # K1
            pl.BlockSpec((1, W * Cb), lambda n: (0, 0)),                # b1 tiled
            pl.BlockSpec((W * Cb, Wo * Ct), lambda n: (0, 0)),          # folded W-conv
            pl.BlockSpec((1, Wo * Ct), lambda n: (0, 0)),               # bw tiled
            pl.BlockSpec((3, D * Ho, D * H), lambda n: (0, 0, 0)),      # H row-selects
            pl.BlockSpec((3, Wo * Ct, Wo * Ct), lambda n: (0, 0, 0)),   # H channel mix
            pl.BlockSpec((1, Wo * Ct), lambda n: (0, 0)),               # bh tiled
            pl.BlockSpec((3, Do * Ho, D * Ho), lambda n: (0, 0, 0)),    # D row-selects
            pl.BlockSpec((3, Wo * Ct, Wo * Ct), lambda n: (0, 0, 0)),   # D channel mix
            pl.BlockSpec((1, Wo * Ct), lambda n: (0, 0)),               # bd tiled
            pl.BlockSpec((3, W * Cin, Wo * Cin), lambda n: (0, 0, 0)),  # W pool selects
            pl.BlockSpec((Wo * Cin, Wo * Ctot), lambda n: (0, 0)),      # place tower1
            pl.BlockSpec((Wo * Ct, Wo * Ctot), lambda n: (0, 0)),       # place tower2
        ],
        out_specs=pl.BlockSpec((1, Do * Ho, Wo * Ctot), lambda n: (n, 0, 0)),
        compiler_params=pltpu.CompilerParams(dimension_semantics=("parallel",)),
    )(x2, K1, b1r, MW, bwr, SH, KH, bhr, SD, KD, bdr, PW, P1, P2)

    out = out2d.reshape(N, Do, Ho, Wo, Ctot)
    return jnp.transpose(out, (0, 4, 1, 2, 3))      # NDHWC -> NCDHW


# ------------------------- plain-JAX reference (check) ----------------------- #

def _reference_forward(x_ncdhw, params):
    x = jnp.transpose(x_ncdhw, (0, 2, 3, 4, 1)).astype(jnp.float32)
    _, D, H, W, _ = x.shape
    Do, Ho, Wo = _out_len(D), _out_len(H), _out_len(W)

    def taps(v, axis, Lo):
        return [lax.slice_in_dim(v, t, t + 2 * (Lo - 1) + 1, stride=2, axis=axis)
                for t in range(3)]

    def pool1d(v, axis, Lo):
        a, b, c = taps(v, axis, Lo)
        return jnp.maximum(jnp.maximum(a, b), c)

    t1 = pool1d(pool1d(pool1d(x, 3, Wo), 2, Ho), 1, Do)

    def conv1d(v, axis, Lo, w3, b):
        ts = taps(v, axis, Lo)
        out = sum(jnp.einsum("ndhwc,ck->ndhwk", ts[t], w3[t]) for t in range(3))
        return _selu(out + b)

    y = _selu(jnp.einsum("ndhwc,ck->ndhwk", x, params["w1"]) + params["b1"])
    y = conv1d(y, 3, Wo, params["ww"], params["bw"])
    y = conv1d(y, 2, Ho, params["wh"], params["bh"])
    y = conv1d(y, 1, Do, params["wd"], params["bd"])

    out = jnp.concatenate([t1, y], axis=-1)
    return jnp.transpose(out, (0, 4, 1, 2, 3))


def init_params(key, in_channels, bottle_channels, tower2_out_channels):
    ks = jax.random.split(key, 8)
    s = 0.1
    f32 = jnp.float32
    return {
        "w1": s * jax.random.normal(ks[0], (in_channels, bottle_channels), f32),
        "b1": s * jax.random.normal(ks[1], (bottle_channels,), f32),
        # factorized SplitConv3d: 1-D k=3 s=2 convs along W, H, D (assumed; see TODO)
        "ww": s * jax.random.normal(ks[2], (3, bottle_channels, tower2_out_channels), f32),
        "bw": s * jax.random.normal(ks[3], (tower2_out_channels,), f32),
        "wh": s * jax.random.normal(ks[4], (3, tower2_out_channels, tower2_out_channels), f32),
        "bh": s * jax.random.normal(ks[5], (tower2_out_channels,), f32),
        "wd": s * jax.random.normal(ks[6], (3, tower2_out_channels, tower2_out_channels), f32),
        "bd": s * jax.random.normal(ks[7], (tower2_out_channels,), f32),
    }


if __name__ == "__main__":
    key = jax.random.PRNGKey(0)
    kx, kp = jax.random.split(key)
    in_channels, bottle_channels, tower2_out_channels = 4, 8, 8
    x = jax.random.normal(kx, (2, in_channels, 9, 9, 9), jnp.float32)
    params = init_params(kp, in_channels, bottle_channels, tower2_out_channels)

    out = jax.jit(reduction_forward)(x, params)
    out = jax.block_until_ready(out)
    assert out.shape == (2, in_channels + tower2_out_channels, 4, 4, 4), out.shape
    assert bool(jnp.all(jnp.isfinite(out)))

    # Numerical sanity check against a plain-JAX reference of the same
    # (assumed) architecture; tolerance is loose enough for any MXU precision.
    ref = _reference_forward(x, params)
    max_err = float(jnp.max(jnp.abs(out - ref)))
    tol = 2e-2 * (1.0 + float(jnp.max(jnp.abs(ref))))
    assert max_err < tol, (max_err, tol)

    print("KERNEL_OK")
</pallas_src>

<mosaic_0001>
module attributes {stable_mosaic.version = 11 : i64} {
  func.func @_reduction_kernel(%arg0: i32, %arg1: memref<1x81x36xf32, #tpu.memory_space<vmem>>, %arg2: memref<36x72xf32, #tpu.memory_space<vmem>>, %arg3: memref<1x72xf32, #tpu.memory_space<vmem>>, %arg4: memref<72x32xf32, #tpu.memory_space<vmem>>, %arg5: memref<1x32xf32, #tpu.memory_space<vmem>>, %arg6: memref<3x36x81xf32, #tpu.memory_space<vmem>>, %arg7: memref<3x32x32xf32, #tpu.memory_space<vmem>>, %arg8: memref<1x32xf32, #tpu.memory_space<vmem>>, %arg9: memref<3x16x36xf32, #tpu.memory_space<vmem>>, %arg10: memref<3x32x32xf32, #tpu.memory_space<vmem>>, %arg11: memref<1x32xf32, #tpu.memory_space<vmem>>, %arg12: memref<3x36x16xf32, #tpu.memory_space<vmem>>, %arg13: memref<16x48xf32, #tpu.memory_space<vmem>>, %arg14: memref<32x48xf32, #tpu.memory_space<vmem>>, %arg15: memref<1x16x48xf32, #tpu.memory_space<vmem>>) attributes {dimension_semantics = [#tpu.dimension_semantics<parallel>], iteration_bounds = array<i64: 2>, scalar_prefetch = 0 : i64, scratch_operands = 0 : i64, tpu.core_type = #tpu.core_type<tc>, window_params = [{transform_indices = @transform_0, window_bounds = array<i64: 1, 81, 36>}, {pipeline_mode = #tpu.pipeline_mode<synchronous>, transform_indices = @transform_1, window_bounds = array<i64: 36, 72>}, {pipeline_mode = #tpu.pipeline_mode<synchronous>, transform_indices = @transform_2, window_bounds = array<i64: 1, 72>}, {pipeline_mode = #tpu.pipeline_mode<synchronous>, transform_indices = @transform_3, window_bounds = array<i64: 72, 32>}, {pipeline_mode = #tpu.pipeline_mode<synchronous>, transform_indices = @transform_4, window_bounds = array<i64: 1, 32>}, {pipeline_mode = #tpu.pipeline_mode<synchronous>, transform_indices = @transform_5, window_bounds = array<i64: 3, 36, 81>}, {pipeline_mode = #tpu.pipeline_mode<synchronous>, transform_indices = @transform_6, window_bounds = array<i64: 3, 32, 32>}, {pipeline_mode = #tpu.pipeline_mode<synchronous>, transform_indices = @transform_7, window_bounds = array<i64: 1, 32>}, {pipeline_mode = #tpu.pipeline_mode<synchronous>, transform_indices = @transform_8, window_bounds = array<i64: 3, 16, 36>}, {pipeline_mode = #tpu.pipeline_mode<synchronous>, transform_indices = @transform_9, window_bounds = array<i64: 3, 32, 32>}, {pipeline_mode = #tpu.pipeline_mode<synchronous>, transform_indices = @transform_10, window_bounds = array<i64: 1, 32>}, {pipeline_mode = #tpu.pipeline_mode<synchronous>, transform_indices = @transform_11, window_bounds = array<i64: 3, 36, 16>}, {pipeline_mode = #tpu.pipeline_mode<synchronous>, transform_indices = @transform_12, window_bounds = array<i64: 16, 48>}, {pipeline_mode = #tpu.pipeline_mode<synchronous>, transform_indices = @transform_13, window_bounds = array<i64: 32, 48>}, {transform_indices = @transform_14, window_bounds = array<i64: 1, 16, 48>}]} {
    %c0 = arith.constant 0 : index
    %c0_0 = arith.constant 0 : index
    %c0_1 = arith.constant 0 : index
    %0 = vector.load %arg1[%c0, %c0_0, %c0_1] : memref<1x81x36xf32, #tpu.memory_space<vmem>>, vector<1x81x36xf32>
    %1 = vector.shape_cast %0 : vector<1x81x36xf32> to vector<81x36xf32>
    %c0_2 = arith.constant 0 : index
    %c0_3 = arith.constant 0 : index
    %2 = vector.load %arg2[%c0_2, %c0_3] : memref<36x72xf32, #tpu.memory_space<vmem>>, vector<36x72xf32>
    %cst = arith.constant dense<0.000000e+00> : vector<81x72xf32>
    %3 = tpu.matmul %1, %2, %cst {dimension_numbers = #tpu.dot_dimension_numbers<[1], [0], [0], [1], [0, 0, 1, 1], [], []>} : vector<81x36xf32>, vector<36x72xf32>, vector<81x72xf32> -> vector<81x72xf32>
    %c0_4 = arith.constant 0 : index
    %c0_5 = arith.constant 0 : index
    %4 = vector.load %arg3[%c0_4, %c0_5] : memref<1x72xf32, #tpu.memory_space<vmem>>, vector<1x72xf32>
    %5 = vector.broadcast %4 : vector<1x72xf32> to vector<81x72xf32>
    %6 = arith.addf %3, %5 : vector<81x72xf32>
    %cst_6 = arith.constant 0.000000e+00 : f32
    %7 = vector.broadcast %cst_6 : f32 to vector<81x72xf32>
    %8 = arith.cmpf ogt, %6, %7 : vector<81x72xf32>
    %9 = math.exp %6 : vector<81x72xf32>
    %cst_7 = arith.constant 1.000000e+00 : f32
    %10 = vector.broadcast %cst_7 : f32 to vector<81x72xf32>
    %11 = arith.subf %9, %10 : vector<81x72xf32>
    %cst_8 = arith.constant 1.67326319 : f32
    %12 = vector.broadcast %cst_8 : f32 to vector<81x72xf32>
    %13 = arith.mulf %12, %11 : vector<81x72xf32>
    %14 = arith.select %8, %6, %13 : vector<81x72xi1>, vector<81x72xf32>
    %cst_9 = arith.constant 1.05070102 : f32
    %15 = vector.broadcast %cst_9 : f32 to vector<81x72xf32>
    %16 = arith.mulf %15, %14 : vector<81x72xf32>
    %c0_10 = arith.constant 0 : index
    %c0_11 = arith.constant 0 : index
    %17 = vector.load %arg4[%c0_10, %c0_11] : memref<72x32xf32, #tpu.memory_space<vmem>>, vector<72x32xf32>
    %cst_12 = arith.constant dense<0.000000e+00> : vector<81x32xf32>
    %18 = tpu.matmul %16, %17, %cst_12 {dimension_numbers = #tpu.dot_dimension_numbers<[1], [0], [0], [1], [0, 0, 1, 1], [], []>} : vector<81x72xf32>, vector<72x32xf32>, vector<81x32xf32> -> vector<81x32xf32>
    %c0_13 = arith.constant 0 : index
    %c0_14 = arith.constant 0 : index
    %19 = vector.load %arg5[%c0_13, %c0_14] : memref<1x32xf32, #tpu.memory_space<vmem>>, vector<1x32xf32>
    %20 = vector.broadcast %19 : vector<1x32xf32> to vector<81x32xf32>
    %21 = arith.addf %18, %20 : vector<81x32xf32>
    %cst_15 = arith.constant 0.000000e+00 : f32
    %22 = vector.broadcast %cst_15 : f32 to vector<81x32xf32>
    %23 = arith.cmpf ogt, %21, %22 : vector<81x32xf32>
    %24 = math.exp %21 : vector<81x32xf32>
    %cst_16 = arith.constant 1.000000e+00 : f32
    %25 = vector.broadcast %cst_16 : f32 to vector<81x32xf32>
    %26 = arith.subf %24, %25 : vector<81x32xf32>
    %cst_17 = arith.constant 1.67326319 : f32
    %27 = vector.broadcast %cst_17 : f32 to vector<81x32xf32>
    %28 = arith.mulf %27, %26 : vector<81x32xf32>
    %29 = arith.select %23, %21, %28 : vector<81x32xi1>, vector<81x32xf32>
    %cst_18 = arith.constant 1.05070102 : f32
    %30 = vector.broadcast %cst_18 : f32 to vector<81x32xf32>
    %31 = arith.mulf %30, %29 : vector<81x32xf32>
    %c0_19 = arith.constant 0 : index
    %c0_20 = arith.constant 0 : index
    %c0_21 = arith.constant 0 : index
    %32 = vector.load %arg6[%c0_19, %c0_20, %c0_21] : memref<3x36x81xf32, #tpu.memory_space<vmem>>, vector<1x36x81xf32>
    %33 = vector.shape_cast %32 : vector<1x36x81xf32> to vector<36x81xf32>
    %cst_22 = arith.constant dense<0.000000e+00> : vector<36x32xf32>
    %34 = tpu.matmul %33, %31, %cst_22 {dimension_numbers = #tpu.dot_dimension_numbers<[1], [0], [0], [1], [0, 0, 1, 1], [], []>} : vector<36x81xf32>, vector<81x32xf32>, vector<36x32xf32> -> vector<36x32xf32>
    %c0_23 = arith.constant 0 : index
    %c0_24 = arith.constant 0 : index
    %c0_25 = arith.constant 0 : index
    %35 = vector.load %arg7[%c0_23, %c0_24, %c0_25] : memref<3x32x32xf32, #tpu.memory_space<vmem>>, vector<1x32x32xf32>
    %36 = vector.shape_cast %35 : vector<1x32x32xf32> to vector<32x32xf32>
    %cst_26 = arith.constant dense<0.000000e+00> : vector<36x32xf32>
    %37 = tpu.matmul %34, %36, %cst_26 {dimension_numbers = #tpu.dot_dimension_numbers<[1], [0], [0], [1], [0, 0, 1, 1], [], []>} : vector<36x32xf32>, vector<32x32xf32>, vector<36x32xf32> -> vector<36x32xf32>
    %c1 = arith.constant 1 : index
    %c0_27 = arith.constant 0 : index
    %c0_28 = arith.constant 0 : index
    %38 = vector.load %arg6[%c1, %c0_27, %c0_28] : memref<3x36x81xf32, #tpu.memory_space<vmem>>, vector<1x36x81xf32>
    %39 = vector.shape_cast %38 : vector<1x36x81xf32> to vector<36x81xf32>
    %cst_29 = arith.constant dense<0.000000e+00> : vector<36x32xf32>
    %40 = tpu.matmul %39, %31, %cst_29 {dimension_numbers = #tpu.dot_dimension_numbers<[1], [0], [0], [1], [0, 0, 1, 1], [], []>} : vector<36x81xf32>, vector<81x32xf32>, vector<36x32xf32> -> vector<36x32xf32>
    %c1_30 = arith.constant 1 : index
    %c0_31 = arith.constant 0 : index
    %c0_32 = arith.constant 0 : index
    %41 = vector.load %arg7[%c1_30, %c0_31, %c0_32] : memref<3x32x32xf32, #tpu.memory_space<vmem>>, vector<1x32x32xf32>
    %42 = vector.shape_cast %41 : vector<1x32x32xf32> to vector<32x32xf32>
    %cst_33 = arith.constant dense<0.000000e+00> : vector<36x32xf32>
    %43 = tpu.matmul %40, %42, %cst_33 {dimension_numbers = #tpu.dot_dimension_numbers<[1], [0], [0], [1], [0, 0, 1, 1], [], []>} : vector<36x32xf32>, vector<32x32xf32>, vector<36x32xf32> -> vector<36x32xf32>
    %44 = arith.addf %37, %43 : vector<36x32xf32>
    %c2 = arith.constant 2 : index
    %c0_34 = arith.constant 0 : index
    %c0_35 = arith.constant 0 : index
    %45 = vector.load %arg6[%c2, %c0_34, %c0_35] : memref<3x36x81xf32, #tpu.memory_space<vmem>>, vector<1x36x81xf32>
    %46 = vector.shape_cast %45 : vector<1x36x81xf32> to vector<36x81xf32>
    %cst_36 = arith.constant dense<0.000000e+00> : vector<36x32xf32>
    %47 = tpu.matmul %46, %31, %cst_36 {dimension_numbers = #tpu.dot_dimension_numbers<[1], [0], [0], [1], [0, 0, 1, 1], [], []>} : vector<36x81xf32>, vector<81x32xf32>, vector<36x32xf32> -> vector<36x32xf32>
    %c2_37 = arith.constant 2 : index
    %c0_38 = arith.constant 0 : index
    %c0_39 = arith.constant 0 : index
    %48 = vector.load %arg7[%c2_37, %c0_38, %c0_39] : memref<3x32x32xf32, #tpu.memory_space<vmem>>, vector<1x32x32xf32>
    %49 = vector.shape_cast %48 : vector<1x32x32xf32> to vector<32x32xf32>
    %cst_40 = arith.constant dense<0.000000e+00> : vector<36x32xf32>
    %50 = tpu.matmul %47, %49, %cst_40 {dimension_numbers = #tpu.dot_dimension_numbers<[1], [0], [0], [1], [0, 0, 1, 1], [], []>} : vector<36x32xf32>, vector<32x32xf32>, vector<36x32xf32> -> vector<36x32xf32>
    %51 = arith.addf %44, %50 : vector<36x32xf32>
    %c0_41 = arith.constant 0 : index
    %c0_42 = arith.constant 0 : index
    %52 = vector.load %arg8[%c0_41, %c0_42] : memref<1x32xf32, #tpu.memory_space<vmem>>, vector<1x32xf32>
    %53 = vector.broadcast %52 : vector<1x32xf32> to vector<36x32xf32>
    %54 = arith.addf %51, %53 : vector<36x32xf32>
    %cst_43 = arith.constant 0.000000e+00 : f32
    %55 = vector.broadcast %cst_43 : f32 to vector<36x32xf32>
    %56 = arith.cmpf ogt, %54, %55 : vector<36x32xf32>
    %57 = math.exp %54 : vector<36x32xf32>
    %cst_44 = arith.constant 1.000000e+00 : f32
    %58 = vector.broadcast %cst_44 : f32 to vector<36x32xf32>
    %59 = arith.subf %57, %58 : vector<36x32xf32>
    %cst_45 = arith.constant 1.67326319 : f32
    %60 = vector.broadcast %cst_45 : f32 to vector<36x32xf32>
    %61 = arith.mulf %60, %59 : vector<36x32xf32>
    %62 = arith.select %56, %54, %61 : vector<36x32xi1>, vector<36x32xf32>
    %cst_46 = arith.constant 1.05070102 : f32
    %63 = vector.broadcast %cst_46 : f32 to vector<36x32xf32>
    %64 = arith.mulf %63, %62 : vector<36x32xf32>
    %c0_47 = arith.constant 0 : index
    %c0_48 = arith.constant 0 : index
    %c0_49 = arith.constant 0 : index
    %65 = vector.load %arg9[%c0_47, %c0_48, %c0_49] : memref<3x16x36xf32, #tpu.memory_space<vmem>>, vector<1x16x36xf32>
    %66 = vector.shape_cast %65 : vector<1x16x36xf32> to vector<16x36xf32>
    %cst_50 = arith.constant dense<0.000000e+00> : vector<16x32xf32>
    %67 = tpu.matmul %66, %64, %cst_50 {dimension_numbers = #tpu.dot_dimension_numbers<[1], [0], [0], [1], [0, 0, 1, 1], [], []>} : vector<16x36xf32>, vector<36x32xf32>, vector<16x32xf32> -> vector<16x32xf32>
    %c0_51 = arith.constant 0 : index
    %c0_52 = arith.constant 0 : index
    %c0_53 = arith.constant 0 : index
    %68 = vector.load %arg10[%c0_51, %c0_52, %c0_53] : memref<3x32x32xf32, #tpu.memory_space<vmem>>, vector<1x32x32xf32>
    %69 = vector.shape_cast %68 : vector<1x32x32xf32> to vector<32x32xf32>
    %cst_54 = arith.constant dense<0.000000e+00> : vector<16x32xf32>
    %70 = tpu.matmul %67, %69, %cst_54 {dimension_numbers = #tpu.dot_dimension_numbers<[1], [0], [0], [1], [0, 0, 1, 1], [], []>} : vector<16x32xf32>, vector<32x32xf32>, vector<16x32xf32> -> vector<16x32xf32>
    %c1_55 = arith.constant 1 : index
    %c0_56 = arith.constant 0 : index
    %c0_57 = arith.constant 0 : index
    %71 = vector.load %arg9[%c1_55, %c0_56, %c0_57] : memref<3x16x36xf32, #tpu.memory_space<vmem>>, vector<1x16x36xf32>
    %72 = vector.shape_cast %71 : vector<1x16x36xf32> to vector<16x36xf32>
    %cst_58 = arith.constant dense<0.000000e+00> : vector<16x32xf32>
    %73 = tpu.matmul %72, %64, %cst_58 {dimension_numbers = #tpu.dot_dimension_numbers<[1], [0], [0], [1], [0, 0, 1, 1], [], []>} : vector<16x36xf32>, vector<36x32xf32>, vector<16x32xf32> -> vector<16x32xf32>
    %c1_59 = arith.constant 1 : index
    %c0_60 = arith.constant 0 : index
    %c0_61 = arith.constant 0 : index
    %74 = vector.load %arg10[%c1_59, %c0_60, %c0_61] : memref<3x32x32xf32, #tpu.memory_space<vmem>>, vector<1x32x32xf32>
    %75 = vector.shape_cast %74 : vector<1x32x32xf32> to vector<32x32xf32>
    %cst_62 = arith.constant dense<0.000000e+00> : vector<16x32xf32>
    %76 = tpu.matmul %73, %75, %cst_62 {dimension_numbers = #tpu.dot_dimension_numbers<[1], [0], [0], [1], [0, 0, 1, 1], [], []>} : vector<16x32xf32>, vector<32x32xf32>, vector<16x32xf32> -> vector<16x32xf32>
    %77 = arith.addf %70, %76 : vector<16x32xf32>
    %c2_63 = arith.constant 2 : index
    %c0_64 = arith.constant 0 : index
    %c0_65 = arith.constant 0 : index
    %78 = vector.load %arg9[%c2_63, %c0_64, %c0_65] : memref<3x16x36xf32, #tpu.memory_space<vmem>>, vector<1x16x36xf32>
    %79 = vector.shape_cast %78 : vector<1x16x36xf32> to vector<16x36xf32>
    %cst_66 = arith.constant dense<0.000000e+00> : vector<16x32xf32>
    %80 = tpu.matmul %79, %64, %cst_66 {dimension_numbers = #tpu.dot_dimension_numbers<[1], [0], [0], [1], [0, 0, 1, 1], [], []>} : vector<16x36xf32>, vector<36x32xf32>, vector<16x32xf32> -> vector<16x32xf32>
    %c2_67 = arith.constant 2 : index
    %c0_68 = arith.constant 0 : index
    %c0_69 = arith.constant 0 : index
    %81 = vector.load %arg10[%c2_67, %c0_68, %c0_69] : memref<3x32x32xf32, #tpu.memory_space<vmem>>, vector<1x32x32xf32>
    %82 = vector.shape_cast %81 : vector<1x32x32xf32> to vector<32x32xf32>
    %cst_70 = arith.constant dense<0.000000e+00> : vector<16x32xf32>
    %83 = tpu.matmul %80, %82, %cst_70 {dimension_numbers = #tpu.dot_dimension_numbers<[1], [0], [0], [1], [0, 0, 1, 1], [], []>} : vector<16x32xf32>, vector<32x32xf32>, vector<16x32xf32> -> vector<16x32xf32>
    %84 = arith.addf %77, %83 : vector<16x32xf32>
    %c0_71 = arith.constant 0 : index
    %c0_72 = arith.constant 0 : index
    %85 = vector.load %arg11[%c0_71, %c0_72] : memref<1x32xf32, #tpu.memory_space<vmem>>, vector<1x32xf32>
    %86 = vector.broadcast %85 : vector<1x32xf32> to vector<16x32xf32>
    %87 = arith.addf %84, %86 : vector<16x32xf32>
    %cst_73 = arith.constant 0.000000e+00 : f32
    %88 = vector.broadcast %cst_73 : f32 to vector<16x32xf32>
    %89 = arith.cmpf ogt, %87, %88 : vector<16x32xf32>
    %90 = math.exp %87 : vector<16x32xf32>
    %cst_74 = arith.constant 1.000000e+00 : f32
    %91 = vector.broadcast %cst_74 : f32 to vector<16x32xf32>
    %92 = arith.subf %90, %91 : vector<16x32xf32>
    %cst_75 = arith.constant 1.67326319 : f32
    %93 = vector.broadcast %cst_75 : f32 to vector<16x32xf32>
    %94 = arith.mulf %93, %92 : vector<16x32xf32>
    %95 = arith.select %89, %87, %94 : vector<16x32xi1>, vector<16x32xf32>
    %cst_76 = arith.constant 1.05070102 : f32
    %96 = vector.broadcast %cst_76 : f32 to vector<16x32xf32>
    %97 = arith.mulf %96, %95 : vector<16x32xf32>
    %c0_77 = arith.constant 0 : index
    %c0_78 = arith.constant 0 : index
    %c0_79 = arith.constant 0 : index
    %98 = vector.load %arg12[%c0_77, %c0_78, %c0_79] : memref<3x36x16xf32, #tpu.memory_space<vmem>>, vector<1x36x16xf32>
    %99 = vector.shape_cast %98 : vector<1x36x16xf32> to vector<36x16xf32>
    %cst_80 = arith.constant dense<0.000000e+00> : vector<81x16xf32>
    %100 = tpu.matmul %1, %99, %cst_80 {dimension_numbers = #tpu.dot_dimension_numbers<[1], [0], [0], [1], [0, 0, 1, 1], [], []>} : vector<81x36xf32>, vector<36x16xf32>, vector<81x16xf32> -> vector<81x16xf32>
    %c1_81 = arith.constant 1 : index
    %c0_82 = arith.constant 0 : index
    %c0_83 = arith.constant 0 : index
    %101 = vector.load %arg12[%c1_81, %c0_82, %c0_83] : memref<3x36x16xf32, #tpu.memory_space<vmem>>, vector<1x36x16xf32>
    %102 = vector.shape_cast %101 : vector<1x36x16xf32> to vector<36x16xf32>
    %cst_84 = arith.constant dense<0.000000e+00> : vector<81x16xf32>
    %103 = tpu.matmul %1, %102, %cst_84 {dimension_numbers = #tpu.dot_dimension_numbers<[1], [0], [0], [1], [0, 0, 1, 1], [], []>} : vector<81x36xf32>, vector<36x16xf32>, vector<81x16xf32> -> vector<81x16xf32>
    %104 = arith.maximumf %100, %103 : vector<81x16xf32>
    %c2_85 = arith.constant 2 : index
    %c0_86 = arith.constant 0 : index
    %c0_87 = arith.constant 0 : index
    %105 = vector.load %arg12[%c2_85, %c0_86, %c0_87] : memref<3x36x16xf32, #tpu.memory_space<vmem>>, vector<1x36x16xf32>
    %106 = vector.shape_cast %105 : vector<1x36x16xf32> to vector<36x16xf32>
    %cst_88 = arith.constant dense<0.000000e+00> : vector<81x16xf32>
    %107 = tpu.matmul %1, %106, %cst_88 {dimension_numbers = #tpu.dot_dimension_numbers<[1], [0], [0], [1], [0, 0, 1, 1], [], []>} : vector<81x36xf32>, vector<36x16xf32>, vector<81x16xf32> -> vector<81x16xf32>
    %108 = arith.maximumf %104, %107 : vector<81x16xf32>
    %c0_89 = arith.constant 0 : index
    %c0_90 = arith.constant 0 : index
    %c0_91 = arith.constant 0 : index
    %109 = vector.load %arg6[%c0_89, %c0_90, %c0_91] : memref<3x36x81xf32, #tpu.memory_space<vmem>>, vector<1x36x81xf32>
    %110 = vector.shape_cast %109 : vector<1x36x81xf32> to vector<36x81xf32>
    %cst_92 = arith.constant dense<0.000000e+00> : vector<36x16xf32>
    %111 = tpu.matmul %110, %108, %cst_92 {dimension_numbers = #tpu.dot_dimension_numbers<[1], [0], [0], [1], [0, 0, 1, 1], [], []>} : vector<36x81xf32>, vector<81x16xf32>, vector<36x16xf32> -> vector<36x16xf32>
    %c1_93 = arith.constant 1 : index
    %c0_94 = arith.constant 0 : index
    %c0_95 = arith.constant 0 : index
    %112 = vector.load %arg6[%c1_93, %c0_94, %c0_95] : memref<3x36x81xf32, #tpu.memory_space<vmem>>, vector<1x36x81xf32>
    %113 = vector.shape_cast %112 : vector<1x36x81xf32> to vector<36x81xf32>
    %cst_96 = arith.constant dense<0.000000e+00> : vector<36x16xf32>
    %114 = tpu.matmul %113, %108, %cst_96 {dimension_numbers = #tpu.dot_dimension_numbers<[1], [0], [0], [1], [0, 0, 1, 1], [], []>} : vector<36x81xf32>, vector<81x16xf32>, vector<36x16xf32> -> vector<36x16xf32>
    %115 = arith.maximumf %111, %114 : vector<36x16xf32>
    %c2_97 = arith.constant 2 : index
    %c0_98 = arith.constant 0 : index
    %c0_99 = arith.constant 0 : index
    %116 = vector.load %arg6[%c2_97, %c0_98, %c0_99] : memref<3x36x81xf32, #tpu.memory_space<vmem>>, vector<1x36x81xf32>
    %117 = vector.shape_cast %116 : vector<1x36x81xf32> to vector<36x81xf32>
    %cst_100 = arith.constant dense<0.000000e+00> : vector<36x16xf32>
    %118 = tpu.matmul %117, %108, %cst_100 {dimension_numbers = #tpu.dot_dimension_numbers<[1], [0], [0], [1], [0, 0, 1, 1], [], []>} : vector<36x81xf32>, vector<81x16xf32>, vector<36x16xf32> -> vector<36x16xf32>
    %119 = arith.maximumf %115, %118 : vector<36x16xf32>
    %c0_101 = arith.constant 0 : index
    %c0_102 = arith.constant 0 : index
    %c0_103 = arith.constant 0 : index
    %120 = vector.load %arg9[%c0_101, %c0_102, %c0_103] : memref<3x16x36xf32, #tpu.memory_space<vmem>>, vector<1x16x36xf32>
    %121 = vector.shape_cast %120 : vector<1x16x36xf32> to vector<16x36xf32>
    %cst_104 = arith.constant dense<0.000000e+00> : vector<16x16xf32>
    %122 = tpu.matmul %121, %119, %cst_104 {dimension_numbers = #tpu.dot_dimension_numbers<[1], [0], [0], [1], [0, 0, 1, 1], [], []>} : vector<16x36xf32>, vector<36x16xf32>, vector<16x16xf32> -> vector<16x16xf32>
    %c1_105 = arith.constant 1 : index
    %c0_106 = arith.constant 0 : index
    %c0_107 = arith.constant 0 : index
    %123 = vector.load %arg9[%c1_105, %c0_106, %c0_107] : memref<3x16x36xf32, #tpu.memory_space<vmem>>, vector<1x16x36xf32>
    %124 = vector.shape_cast %123 : vector<1x16x36xf32> to vector<16x36xf32>
    %cst_108 = arith.constant dense<0.000000e+00> : vector<16x16xf32>
    %125 = tpu.matmul %124, %119, %cst_108 {dimension_numbers = #tpu.dot_dimension_numbers<[1], [0], [0], [1], [0, 0, 1, 1], [], []>} : vector<16x36xf32>, vector<36x16xf32>, vector<16x16xf32> -> vector<16x16xf32>
    %126 = arith.maximumf %122, %125 : vector<16x16xf32>
    %c2_109 = arith.constant 2 : index
    %c0_110 = arith.constant 0 : index
    %c0_111 = arith.constant 0 : index
    %127 = vector.load %arg9[%c2_109, %c0_110, %c0_111] : memref<3x16x36xf32, #tpu.memory_space<vmem>>, vector<1x16x36xf32>
    %128 = vector.shape_cast %127 : vector<1x16x36xf32> to vector<16x36xf32>
    %cst_112 = arith.constant dense<0.000000e+00> : vector<16x16xf32>
    %129 = tpu.matmul %128, %119, %cst_112 {dimension_numbers = #tpu.dot_dimension_numbers<[1], [0], [0], [1], [0, 0, 1, 1], [], []>} : vector<16x36xf32>, vector<36x16xf32>, vector<16x16xf32> -> vector<16x16xf32>
    %130 = arith.maximumf %126, %129 : vector<16x16xf32>
    %c0_113 = arith.constant 0 : index
    %c0_114 = arith.constant 0 : index
    %131 = vector.load %arg13[%c0_113, %c0_114] : memref<16x48xf32, #tpu.memory_space<vmem>>, vector<16x48xf32>
    %cst_115 = arith.constant dense<0.000000e+00> : vector<16x48xf32>
    %132 = tpu.matmul %130, %131, %cst_115 {dimension_numbers = #tpu.dot_dimension_numbers<[1], [0], [0], [1], [0, 0, 1, 1], [], []>} : vector<16x16xf32>, vector<16x48xf32>, vector<16x48xf32> -> vector<16x48xf32>
    %c0_116 = arith.constant 0 : index
    %c0_117 = arith.constant 0 : index
    %133 = vector.load %arg14[%c0_116, %c0_117] : memref<32x48xf32, #tpu.memory_space<vmem>>, vector<32x48xf32>
    %cst_118 = arith.constant dense<0.000000e+00> : vector<16x48xf32>
    %134 = tpu.matmul %97, %133, %cst_118 {dimension_numbers = #tpu.dot_dimension_numbers<[1], [0], [0], [1], [0, 0, 1, 1], [], []>} : vector<16x32xf32>, vector<32x48xf32>, vector<16x48xf32> -> vector<16x48xf32>
    %135 = arith.addf %132, %134 : vector<16x48xf32>
    %c0_119 = arith.constant 0 : index
    %c0_120 = arith.constant 0 : index
    %c0_121 = arith.constant 0 : index
    %136 = vector.load %arg15[%c0_119, %c0_120, %c0_121] : memref<1x16x48xf32, #tpu.memory_space<vmem>>, vector<1x16x48xf32>
    %137 = vector.shape_cast %136 : vector<1x16x48xf32> to vector<16x48xf32>
    %138 = vector.shape_cast %135 : vector<16x48xf32> to vector<1x16x48xf32>
    tpu.vector_store %arg15[%c0_119, %c0_120, %c0_121], %138 {strides = array<i32>} : memref<1x16x48xf32, #tpu.memory_space<vmem>>, vector<1x16x48xf32>,
    return
  }
  func.func @transform_0(%arg0: i32) -> (i32, i32, i32) {
    %c0_i32 = arith.constant 0 : i32
    %c0_i32_0 = arith.constant 0 : i32
    %c0_i32_1 = arith.constant 0 : i32
    return %arg0, %c0_i32, %c0_i32_0 : i32, i32, i32
  }
  func.func @transform_1(%arg0: i32) -> (i32, i32) {
    %c0_i32 = arith.constant 0 : i32
    %c0_i32_0 = arith.constant 0 : i32
    %c0_i32_1 = arith.constant 0 : i32
    return %c0_i32, %c0_i32_0 : i32, i32
  }
  func.func @transform_2(%arg0: i32) -> (i32, i32) {
    %c0_i32 = arith.constant 0 : i32
    %c0_i32_0 = arith.constant 0 : i32
    %c0_i32_1 = arith.constant 0 : i32
    return %c0_i32, %c0_i32_0 : i32, i32
  }
  func.func @transform_3(%arg0: i32) -> (i32, i32) {
    %c0_i32 = arith.constant 0 : i32
    %c0_i32_0 = arith.constant 0 : i32
    %c0_i32_1 = arith.constant 0 : i32
    return %c0_i32, %c0_i32_0 : i32, i32
  }
  func.func @transform_4(%arg0: i32) -> (i32, i32) {
    %c0_i32 = arith.constant 0 : i32
    %c0_i32_0 = arith.constant 0 : i32
    %c0_i32_1 = arith.constant 0 : i32
    return %c0_i32, %c0_i32_0 : i32, i32
  }
  func.func @transform_5(%arg0: i32) -> (i32, i32, i32) {
    %c0_i32 = arith.constant 0 : i32
    %c0_i32_0 = arith.constant 0 : i32
    %c0_i32_1 = arith.constant 0 : i32
    %c0_i32_2 = arith.constant 0 : i32
    return %c0_i32, %c0_i32_0, %c0_i32_1 : i32, i32, i32
  }
  func.func @transform_6(%arg0: i32) -> (i32, i32, i32) {
    %c0_i32 = arith.constant 0 : i32
    %c0_i32_0 = arith.constant 0 : i32
    %c0_i32_1 = arith.constant 0 : i32
    %c0_i32_2 = arith.constant 0 : i32
    return %c0_i32, %c0_i32_0, %c0_i32_1 : i32, i32, i32
  }
  func.func @transform_7(%arg0: i32) -> (i32, i32) {
    %c0_i32 = arith.constant 0 : i32
    %c0_i32_0 = arith.constant 0 : i32
    %c0_i32_1 = arith.constant 0 : i32
    return %c0_i32, %c0_i32_0 : i32, i32
  }
  func.func @transform_8(%arg0: i32) -> (i32, i32, i32) {
    %c0_i32 = arith.constant 0 : i32
    %c0_i32_0 = arith.constant 0 : i32
    %c0_i32_1 = arith.constant 0 : i32
    %c0_i32_2 = arith.constant 0 : i32
    return %c0_i32, %c0_i32_0, %c0_i32_1 : i32, i32, i32
  }
  func.func @transform_9(%arg0: i32) -> (i32, i32, i32) {
    %c0_i32 = arith.constant 0 : i32
    %c0_i32_0 = arith.constant 0 : i32
    %c0_i32_1 = arith.constant 0 : i32
    %c0_i32_2 = arith.constant 0 : i32
    return %c0_i32, %c0_i32_0, %c0_i32_1 : i32, i32, i32
  }
  func.func @transform_10(%arg0: i32) -> (i32, i32) {
    %c0_i32 = arith.constant 0 : i32
    %c0_i32_0 = arith.constant 0 : i32
    %c0_i32_1 = arith.constant 0 : i32
    return %c0_i32, %c0_i32_0 : i32, i32
  }
  func.func @transform_11(%arg0: i32) -> (i32, i32, i32) {
    %c0_i32 = arith.constant 0 : i32
    %c0_i32_0 = arith.constant 0 : i32
    %c0_i32_1 = arith.constant 0 : i32
    %c0_i32_2 = arith.constant 0 : i32
    return %c0_i32, %c0_i32_0, %c0_i32_1 : i32, i32, i32
  }
  func.func @transform_12(%arg0: i32) -> (i32, i32) {
    %c0_i32 = arith.constant 0 : i32
    %c0_i32_0 = arith.constant 0 : i32
    %c0_i32_1 = arith.constant 0 : i32
    return %c0_i32, %c0_i32_0 : i32, i32
  }
  func.func @transform_13(%arg0: i32) -> (i32, i32) {
    %c0_i32 = arith.constant 0 : i32
    %c0_i32_0 = arith.constant 0 : i32
    %c0_i32_1 = arith.constant 0 : i32
    return %c0_i32, %c0_i32_0 : i32, i32
  }
  func.func @transform_14(%arg0: i32) -> (i32, i32, i32) {
    %c0_i32 = arith.constant 0 : i32
    %c0_i32_0 = arith.constant 0 : i32
    %c0_i32_1 = arith.constant 0 : i32
    return %arg0, %c0_i32, %c0_i32_0 : i32, i32, i32
  }
}

</mosaic_0001>

<bundles_post_ra>
// kernel: tile.23
= control target key start
LH: loop header
LB: loop body
LE: loop exit
PB: predicated region body
PF: predicated region fallthrough
CT: control target
= control target key end

     0   :  { %s28_s0 = inlined_call_operand.vmem [shape: f32[8], index: 0, kind: input, shape index: {}]   ;;  %s29_s1 = inlined_call_operand.vmem [shape: f32[9,8], index: 1, kind: output, shape index: {}]  }
   0x1   :  { %v4_v0 = vld [vmem:[%s28_s0] ss:$0 sm:$0xff] }
   0x2   :  { %5 = vst [vmem:[%s29_s1] sm:$0xff] %v4_v0 }
   0x3   :  { %8 = vst [vmem:[%s29_s1 + $0x8] sm:$0xff] %v4_v0 }

// kernel: tile.24
= control target key start
LH: loop header
LB: loop body
LE: loop exit
PB: predicated region body
PF: predicated region fallthrough
CT: control target
= control target key end

     0   :  { %s75_s10 = smov 64   ;;  %s76_s11 = smov 48   ;;  %vm3_vm0 = vcmask 64512   ;;  %vm9_vm1 = vcmask 589312   ;;  %vm15_vm2 = vcmask 523712   ;;  %vm21_vm3 = vcmask 458112   ;;  %s123_s0 = inlined_call_operand.vmem [shape: f32[9,8], index: 0, kind: input, shape index: {}]   ;;  %s124_s1 = inlined_call_operand.vmem [shape: f32[1,72], index: 1, kind: output, shape index: {}]  }
   0x1   :  { %v59_v0 = vld [vmem:[%s123_s0 + $0x8] sm:$0x1]   ;;  %v61_v1 = vld [vmem:[%s123_s0 + $0x6] sm:$0x1]   ;;  %v63_v2 = vld [vmem:[%s123_s0 + $0x4] sm:$0x1]  }
   0x2   :  { %7 = vrot.lane.b32.xlu0 %v59_v0, %s75_s10  ;;  %19 = vrot.lane.b32.xlu1 %v61_v1, %s76_s11  ;;  %s77_s14 = smov 32   ;;  %v60_v3 = vld [vmem:[%s123_s0 + $0x7] sm:$0x1]   ;;  %v62_v4 = vld [vmem:[%s123_s0 + $0x5] sm:$0x1]   ;;  %s78_s19 = smov 56  }
   0x3   :  { %31 = vrot.lane.b32.xlu2 %v63_v2, %s77_s14  ;;  %s79_s20 = smov 40   ;;  %v64_v5 = vld [vmem:[%s123_s0 + $0x3] sm:$0x1]   ;;  %s80_s23 = smov 24   ;;  %v65_v6 = vld [vmem:[%s123_s0 + $0x2] sm:$0x1]  }
   0x4   :  { %v66_v7 = vld [vmem:[%s123_s0 + $0x1] sm:$0x1]   ;;  %s81_s28 = smov 16   ;;  %s82_s29 = smov 8   ;;  %v2_v8 = vld [vmem:[%s123_s0] sm:$0x1]  }
   0x5   :  { %4 = vst.msk [vmem:[#allocation0] sm:$0x1] %vm3_vm0, %v2_v8   ;;  %vm27_vm4 = vcmask 392512   ;;  %vm33_vm5 = vcmask 326912   ;;  %vm39_vm6 = vcmask 261312   ;;  %vm45_vm7 = vcmask 195712  }
   0x6   :  { %vm51_vm8 = vcmask 130112  }
   0xa   :  { %13 = vrot.lane.b32.xlu0 %v60_v3, %s78_s19  ;;  %25 = vrot.lane.b32.xlu1 %v62_v4, %s79_s20 }
   0xb   :  { %37 = vrot.lane.b32.xlu2 %v64_v5, %s80_s23 }
  0x12   :  { %43 = vrot.lane.b32.xlu0 %v65_v6, %s81_s28  ;;  %49 = vrot.lane.b32.xlu1 %v66_v7, %s82_s29 }
  0x5d   :  { %v32_v9 = vpop.permute.xlu2 %31  }
  0x65   :  { %v38_v10 = vpop.permute.xlu2 %37  }
  0x74   :  { %v8_v11 = vpop.permute.xlu0 %7   ;;  %v20_v12 = vpop.permute.xlu1 %19  }
  0x75   :  { %10 = vst.msk [vmem:[#allocation0] sm:$0x1] %vm9_vm1, %v8_v11  }
  0x7c   :  { %v14_v13 = vpop.permute.xlu0 %13   ;;  %v26_v14 = vpop.permute.xlu1 %25  }
  0x7d   :  { %16 = vst.msk [vmem:[#allocation0] sm:$0x1] %vm15_vm2, %v14_v13  }
  0x7e   :  { %22 = vst.msk [vmem:[#allocation0] sm:$0x1] %vm21_vm3, %v20_v12  }
  0x7f   :  { %28 = vst.msk [vmem:[#allocation0] sm:$0x1] %vm27_vm4, %v26_v14  }
  0x80   :  { %34 = vst.msk [vmem:[#allocation0] sm:$0x1] %vm33_vm5, %v32_v9  }
  0x81   :  { %40 = vst.msk [vmem:[#allocation0] sm:$0x1] %vm39_vm6, %v38_v10  }
  0x84   :  { %v44_v15 = vpop.permute.xlu0 %43   ;;  %v50_v16 = vpop.permute.xlu1 %49  }
  0x85   :  { %46 = vst.msk [vmem:[#allocation0] sm:$0x1] %vm45_vm7, %v44_v15  }
  0x86   :  { %52 = vst.msk [vmem:[#allocation0] sm:$0x1] %vm51_vm8, %v50_v16  }
  0x8d   :  { %v55_v17 = vld [vmem:[#allocation0] sm:$0x1] }
  0x8e   :  { %58 = vst [vmem:[%s124_s1] sm:$0x1] %v55_v17 }

// kernel: tile.28
= control target key start
LH: loop header
LB: loop body
LE: loop exit
PB: predicated region body
PF: predicated region fallthrough
CT: control target
= control target key end

     0   :  { %s22_s0 = inlined_call_operand.vmem [shape: f32[8], index: 0, kind: input, shape index: {}]   ;;  %s23_s1 = inlined_call_operand.vmem [shape: f32[4,8], index: 1, kind: output, shape index: {}]  }
   0x1   :  { %v4_v0 = vld [vmem:[%s22_s0] ss:$0 sm:$0xff] }
   0x2   :  { %5 = vst [vmem:[%s23_s1] sm:$0xf] %v4_v0 }

// kernel: tile.29
= control target key start
LH: loop header
LB: loop body
LE: loop exit
PB: predicated region body
PF: predicated region fallthrough
CT: control target
= control target key end

     0   :  { %s37_s8 = smov 8   ;;  %s38_s9 = smov 16   ;;  %vm7_vm0 = vcmask 64512   ;;  %vm13_vm1 = vcmask 261312   ;;  %vm19_vm2 = vcmask 195712   ;;  %vm25_vm3 = vcmask 130112   ;;  %s55_s0 = inlined_call_operand.vmem [shape: f32[4,8], index: 0, kind: input, shape index: {}]   ;;  %s56_s1 = inlined_call_operand.vmem [shape: f32[1,32], index: 1, kind: output, shape index: {}]  }
   0x1   :  { %v4_v0 = vld [vmem:[%s55_s0] sm:$0xf]  ;;  %s36_s0 = smov 24  }
   0x2   :  { %5 = vst [vmem:[#allocation1] sm:$0xf] %v4_v0 }
   0x9   :  { %v10_v1 = vld [vmem:[#allocation1 + $0x3] sm:$0x1]   ;;  %v22_v2 = vld [vmem:[#allocation1 + $0x1] sm:$0x1]   ;;  %v16_v3 = vld [vmem:[#allocation1 + $0x2] sm:$0x1]  }
   0xa   :  { %11 = vrot.lane.b32.xlu0 %v10_v1, %s36_s0  ;;  %23 = vrot.lane.b32.xlu1 %v22_v2, %s37_s8  ;;  %v6_v4 = vld [vmem:[#allocation1] sm:$0x1]  }
   0xb   :  { %8 = vst.msk [vmem:[#allocation0] sm:$0x1] %vm7_vm0, %v6_v4  }
  0x12   :  { %17 = vrot.lane.b32.xlu0 %v16_v3, %s38_s9 }
  0x7c   :  { %v12_v5 = vpop.permute.xlu0 %11   ;;  %v24_v6 = vpop.permute.xlu1 %23  }
  0x7d   :  { %14 = vst.msk [vmem:[#allocation0] sm:$0x1] %vm13_vm1, %v12_v5  }
  0x84   :  { %v18_v7 = vpop.permute.xlu0 %17  }
  0x85   :  { %20 = vst.msk [vmem:[#allocation0] sm:$0x1] %vm19_vm2, %v18_v7  }
  0x86   :  { %26 = vst.msk [vmem:[#allocation0] sm:$0x1] %vm25_vm3, %v24_v6  }
  0x8d   :  { %v29_v8 = vld [vmem:[#allocation0] sm:$0x1] }
  0x8e   :  { %32 = vst [vmem:[%s56_s1] sm:$0x1] %v29_v8 }

// kernel: reduction_forward.1
= control target key start
LH: loop header
LB: loop body
LE: loop exit
PB: predicated region body
PF: predicated region fallthrough
CT: control target
= control target key end

     0   :  { %s2310_s29 = smov 0   ;;  %s2907_s0 = inlined_call_operand.vmem [shape: f32[2,81,36], index: 0, kind: input, shape index: {}]   ;;  %s2908_s1 = inlined_call_operand.vmem [shape: f32[36,72], index: 1, kind: input, shape index: {}]   ;;  %s2909_s2 = inlined_call_operand.vmem [shape: f32[1,72], index: 2, kind: input, shape index: {}]   ;;  %s2910_s3 = inlined_call_operand.vmem [shape: f32[72,32], index: 3, kind: input, shape index: {}]   ;;  %s2911_s4 = inlined_call_operand.vmem [shape: f32[1,32], index: 4, kind: input, shape index: {}]   ;;  %s2912_s5 = inlined_call_operand.vmem [shape: f32[3,36,81], index: 5, kind: input, shape index: {}]   ;;  %s2913_s6 = inlined_call_operand.vmem [shape: f32[3,32,32], index: 6, kind: input, shape index: {}]   ;;  %s2914_s7 = inlined_call_operand.vmem [shape: f32[1,32], index: 7, kind: input, shape index: {}]   ;;  %s2915_s8 = inlined_call_operand.vmem [shape: f32[3,16,36], index: 8, kind: input, shape index: {}]   ;;  %s2916_s9 = inlined_call_operand.vmem [shape: f32[3,32,32], index: 9, kind: input, shape index: {}]   ;;  %s2917_s10 = inlined_call_operand.vmem [shape: f32[1,32], index: 10, kind: input, shape index: {}]   ;;  %s2918_s11 = inlined_call_operand.vmem [shape: f32[3,36,16], index: 11, kind: input, shape index: {}]   ;;  %s2919_s12 = inlined_call_operand.vmem [shape: f32[16,48], index: 12, kind: input, shape index: {}]   ;;  %s2920_s13 = inlined_call_operand.vmem [shape: f32[32,48], index: 13, kind: input, shape index: {}]   ;;  %s2921_s14 = inlined_call_operand.vmem [shape: f32[2,16,48], index: 14, kind: output, shape index: {}]  }
   0x1 LB: > { %s1922_s30 = sadd.s32 4294967295, %s2233_s29   ;;  %p1926_p0 = scmp.ge.s32.totalorder %s2233_s29, 1  ;;  %s2233_s29 = sphi %s2310_s29, %s24_s29  }
   0x2   : > { %p412_p1 = scmp.lt.s32.totalorder %s2233_s29, 3 }
   0x4   : > { %p413_p2 = pnand %p1926_p0, %p412_p1 }
   0x5   : > { %p458_p3 = scmp.lt.s32.totalorder (!%p413_p2), %s1922_s30, 1 }
   0x6   : > { %416 = sbr.rel (%p413_p2) target bundleno = 1661 (0x67d), region = 76 }
   0xb   : > { %v483_v0 = vld [vmem:[%s2908_s1 + $0x20] sm:$0xf]  ;;  %vm522_vm0 = vcmask 1043456   ;;  %v482_v1 = vld [vmem:[%s2908_s1 + $0x18] sm:$0xff]  ;;  %v481_v2 = vld [vmem:[%s2908_s1 + $0x10] sm:$0xff]  ;;  %s2923_s30 = smov (!%p458_p3, %s1922_s30), 1 }
   0xc   : > { %1930 = vmatpush.msk.msra.mxu0 %vm522_vm0, %v483_v0  ;;  %v480_v3 = vld [vmem:[%s2908_s1 + $0x8] sm:$0xff]  ;;  %s2145_s23 = smul.u32 88, %s2923_s30  ;;  %v479_v4 = vld [vmem:[%s2908_s1] sm:$0xff]  ;;  %vm488_vm1 = vcmask 293888   ;;  %v660_v17 = vld [vmem:[%s2910_s3 + $0x38] sm:$0xff]  ;;  %vm666_vm3 = vcmask 588800  }
   0xd   : > { %v661_v16 = vld [vmem:[%s2910_s3 + $0x40] sm:$0xff]  ;;  %v659_v18 = vld [vmem:[%s2910_s3 + $0x30] sm:$0xff]  ;;  %v658_v19 = vld [vmem:[%s2910_s3 + $0x28] sm:$0xff]  ;;  %s2139_s15 = sshll.u32 %s2923_s30, 4 }
   0xe   : > { %538 = vmatpush.msra.mxu0 %v482_v1  ;;  %s2340_s28 = scalar_lea.vmem %s2907_s0, %s2145_s23  ;;  %707 = vmatpush.msra.mxu1 %v661_v16  ;;  %v657_v20 = vld [vmem:[%s2910_s3 + $0x20] sm:$0xff]  ;;  %v656_v21 = vld [vmem:[%s2910_s3 + $0x18] sm:$0xff]  ;;  %v655_v22 = vld [vmem:[%s2910_s3 + $0x10] sm:$0xff]  ;;  %s467_s18 = scalar_lea.vmem %s2921_s14, %s2139_s15 }
   0xf   : > { %v468_v5 = vld [vmem:[%s2340_s28] sm:$0xff]  ;;  %v469_v6 = vld [vmem:[%s2340_s28 + $0x8] sm:$0xff]  ;;  %v470_v7 = vld [vmem:[%s2340_s28 + $0x10] sm:$0xff] }
  0x10   : > { %539 = vmatpush.msra.mxu0 %v481_v2  ;;  %v471_v8 = vld [vmem:[%s2340_s28 + $0x18] sm:$0xff]  ;;  %v472_v9 = vld [vmem:[%s2340_s28 + $0x20] sm:$0xff]  ;;  %v473_v10 = vld [vmem:[%s2340_s28 + $0x28] sm:$0xff]  ;;  %708 = vmatpush.msra.mxu1 %v660_v17 }
  0x11   : > { %v474_v11 = vld [vmem:[%s2340_s28 + $0x30] sm:$0xff]  ;;  %v475_v12 = vld [vmem:[%s2340_s28 + $0x38] sm:$0xff]  ;;  %v476_v13 = vld [vmem:[%s2340_s28 + $0x40] sm:$0xff] }
  0x12   : > { %540 = vmatpush.msra.mxu0 %v480_v3  ;;  %v477_v14 = vld [vmem:[%s2340_s28 + $0x48] sm:$0xff]  ;;  %v478_v15 = vld [vmem:[%s2340_s28 + $0x50] sm:$0x1]  ;;  %709 = vmatpush.msra.mxu1 %v659_v18  ;;  %v653_v24 = vld [vmem:[%s2910_s3] sm:$0xff] }
  0x13   : > { %v654_v23 = vld [vmem:[%s2910_s3 + $0x8] sm:$0xff]  ;;  %v2394_v25 = vld [vmem:[%s2909_s2] ss:$0 sm:$0xff] }
  0x14   : > { %541 = vmatpush.msra.mxu0 %v479_v4  ;;  %710 = vmatpush.msra.mxu1 %v658_v19 }
  0x15   : > { %1931 = vmatmul.msk.f32.vlgmr.msra.gmra.mxu0 %vm488_vm1, %v468_v5 }
  0x16   : > { %711 = vmatpush.msra.mxu1 %v657_v20 }
  0x18   : > { %712 = vmatpush.msra.mxu1 %v656_v21 }
  0x1a   : > { %713 = vmatpush.msra.mxu1 %v655_v22 }
  0x1c   : > { %714 = vmatpush.msra.mxu1 %v654_v23 }
  0x1d   : > { %1932 = vmatmul.msk.f32.gmra.mxu0 %vm488_vm1, %v469_v6 }
  0x1e   : > { %715 = vmatpush.msra.mxu1 %v653_v24 }
  0x25   : > { %1933 = vmatmul.msk.f32.gmra.mxu0 %vm488_vm1, %v470_v7 }
  0x2d   : > { %1934 = vmatmul.msk.f32.gmra.mxu0 %vm488_vm1, %v471_v8 }
  0x35   : > { %1935 = vmatmul.msk.f32.gmra.mxu0 %vm488_vm1, %v472_v9 }
  0x3d   : > { %1936 = vmatmul.msk.f32.gmra.mxu0 %vm488_vm1, %v473_v10 }
  0x45   : > { %1937 = vmatmul.msk.f32.gmra.mxu0 %vm488_vm1, %v474_v11 }
  0x4d   : > { %1938 = vmatmul.msk.f32.gmra.mxu0 %vm488_vm1, %v475_v12 }
  0x55   : > { %1939 = vmatmul.msk.f32.gmra.mxu0 %vm488_vm1, %v476_v13 }
  0x5d   : > { %1940 = vmatmul.msk.f32.gmra.mxu0 %vm488_vm1, %v477_v14 }
  0x65   : > { %1941 = vmatmul.msk.f32.gmra.mxu0 %vm488_vm1, %v478_v15 }
  0x92   : > { %v543_v26 = vpop.f32.mrf.mxu0 }
  0x93   : > { %v544_v27 = vadd.f32 %v2394_v25, %v543_v26 }
  0x95   : > { %v587_v28 = vmul.f32 1.442695, %v544_v27  ;;  %vm576_vm2 = vcmp.gt.f32.partialorder %v544_v27, 0.0 }
  0x97   : > { %2158 = vpow2.f32 %v587_v28 }
  0x9a   : > { %v546_v29 = vpop.f32.mrf.mxu0 }
  0x9b   : > { %v547_v30 = vadd.f32 %v2394_v25, %v546_v29 }
  0x9d   : > { %v2159_v31 = vpop.eup %2158  ;;  %v589_v32 = vmul.f32 1.442695, %v547_v30  ;;  %vm577_vm4 = vcmp.gt.f32.partialorder %v547_v30, 0.0 }
  0x9e   : > { %v1942_v33 = vadd.f32 -1.0, %v2159_v31 }
  0x9f   : > { %2160 = vpow2.f32 %v589_v32 }
  0xa0   : > { %v620_v34 = vmul.f32 1.6732632, %v1942_v33 }
  0xa2   : > { %v549_v35 = vpop.f32.mrf.mxu0  ;;  %v631_v36 = vsel %vm576_vm2, %v544_v27, %v620_v34  ;;  %vm848_vm2 = vcmask 1040384  }
  0xa3   : > { %v550_v37 = vadd.f32 %v2394_v25, %v549_v35  ;;  %v642_v38 = vmul.f32 1.050701, %v631_v36 }
  0xa5   : > { %v2161_v39 = vpop.eup %2160  ;;  %v591_v40 = vmul.f32 1.442695, %v550_v37  ;;  %1953 = vmatmul.msk.f32.vlgmr.msra.gmra.mxu1 %vm666_vm3, %v642_v38  ;;  %vm578_vm5 = vcmp.gt.f32.partialorder %v550_v37, 0.0 }
  0xa6   : > { %v1943_v41 = vadd.f32 -1.0, %v2161_v39 }
  0xa7   : > { %2162 = vpow2.f32 %v591_v40 }
  0xa8   : > { %v621_v42 = vmul.f32 1.6732632, %v1943_v41 }
  0xaa   : > { %v552_v43 = vpop.f32.mrf.mxu0  ;;  %v632_v44 = vsel %vm577_vm4, %v547_v30, %v621_v42 }
  0xab   : > { %v553_v45 = vadd.f32 %v2394_v25, %v552_v43  ;;  %v643_v46 = vmul.f32 1.050701, %v632_v44 }
  0xad   : > { %v2163_v47 = vpop.eup %2162  ;;  %v593_v48 = vmul.f32 1.442695, %v553_v45  ;;  %1954 = vmatmul.msk.f32.gmra.mxu1 %vm666_vm3, %v643_v46  ;;  %vm579_vm6 = vcmp.gt.f32.partialorder %v553_v45, 0.0 }
  0xae   : > { %v1944_v49 = vadd.f32 -1.0, %v2163_v47 }
  0xaf   : > { %2164 = vpow2.f32 %v593_v48 }
  0xb0   : > { %v622_v50 = vmul.f32 1.6732632, %v1944_v49 }
  0xb2   : > { %v555_v51 = vpop.f32.mrf.mxu0  ;;  %v633_v52 = vsel %vm578_vm5, %v550_v37, %v622_v50 }
  0xb3   : > { %v556_v53 = vadd.f32 %v2394_v25, %v555_v51  ;;  %v644_v54 = vmul.f32 1.050701, %v633_v52 }
  0xb5   : > { %v2165_v55 = vpop.eup %2164  ;;  %v595_v56 = vmul.f32 1.442695, %v556_v53  ;;  %1955 = vmatmul.msk.f32.gmra.mxu1 %vm666_vm3, %v644_v54  ;;  %vm580_vm7 = vcmp.gt.f32.partialorder %v556_v53, 0.0 }
  0xb6   : > { %v1945_v57 = vadd.f32 -1.0, %v2165_v55 }
  0xb7   : > { %2166 = vpow2.f32 %v595_v56 }
  0xb8   : > { %v623_v58 = vmul.f32 1.6732632, %v1945_v57 }
  0xba   : > { %v558_v59 = vpop.f32.mrf.mxu0  ;;  %v634_v60 = vsel %vm579_vm6, %v553_v45, %v623_v58 }
  0xbb   : > { %v559_v61 = vadd.f32 %v2394_v25, %v558_v59  ;;  %v645_v62 = vmul.f32 1.050701, %v634_v60  ;;  %v2155_v59 = vld [vmem:[%s2911_s4] ss:$0 sm:$0xff] }
  0xbd   : > { %v2167_v63 = vpop.eup %2166  ;;  %v597_v0 = vmul.f32 1.442695, %v559_v61  ;;  %1956 = vmatmul.msk.f32.gmra.mxu1 %vm666_vm3, %v645_v62  ;;  %vm581_vm8 = vcmp.gt.f32.partialorder %v559_v61, 0.0 }
  0xbe   : > { %v1946_v1 = vadd.f32 -1.0, %v2167_v63 }
  0xbf   : > { %2168 = vpow2.f32 %v597_v0 }
  0xc0   : > { %v624_v2 = vmul.f32 1.6732632, %v1946_v1 }
  0xc2   : > { %v561_v3 = vpop.f32.mrf.mxu0  ;;  %v635_v4 = vsel %vm580_vm7, %v556_v53, %v624_v2 }
  0xc3   : > { %v562_v5 = vadd.f32 %v2394_v25, %v561_v3  ;;  %v646_v6 = vmul.f32 1.050701, %v635_v4 }
  0xc5   : > { %v2169_v7 = vpop.eup %2168  ;;  %v599_v8 = vmul.f32 1.442695, %v562_v5  ;;  %1957 = vmatmul.msk.f32.gmra.mxu1 %vm666_vm3, %v646_v6  ;;  %vm582_vm9 = vcmp.gt.f32.partialorder %v562_v5, 0.0 }
  0xc6   : > { %v1947_v9 = vadd.f32 -1.0, %v2169_v7 }
  0xc7   : > { %2170 = vpow2.f32 %v599_v8 }
  0xc8   : > { %v625_v10 = vmul.f32 1.6732632, %v1947_v9 }
  0xca   : > { %v564_v11 = vpop.f32.mrf.mxu0  ;;  %v636_v12 = vsel %vm581_vm8, %v559_v61, %v625_v10 }
  0xcb   : > { %v565_v13 = vadd.f32 %v2394_v25, %v564_v11  ;;  %v647_v14 = vmul.f32 1.050701, %v636_v12 }
  0xcd   : > { %v2171_v15 = vpop.eup %2170  ;;  %v601_v16 = vmul.f32 1.442695, %v565_v13  ;;  %1958 = vmatmul.msk.f32.gmra.mxu1 %vm666_vm3, %v647_v14  ;;  %vm583_vm10 = vcmp.gt.f32.partialorder %v565_v13, 0.0 }
  0xce   : > { %v1948_v17 = vadd.f32 -1.0, %v2171_v15 }
  0xcf   : > { %2172 = vpow2.f32 %v601_v16 }
  0xd0   : > { %v626_v18 = vmul.f32 1.6732632, %v1948_v17 }
  0xd2   : > { %v567_v19 = vpop.f32.mrf.mxu0  ;;  %v637_v20 = vsel %vm582_vm9, %v562_v5, %v626_v18 }
  0xd3   : > { %v568_v21 = vadd.f32 %v2394_v25, %v567_v19  ;;  %v648_v22 = vmul.f32 1.050701, %v637_v20 }
  0xd5   : > { %v2173_v23 = vpop.eup %2172  ;;  %v603_v24 = vmul.f32 1.442695, %v568_v21  ;;  %1959 = vmatmul.msk.f32.gmra.mxu1 %vm666_vm3, %v648_v22  ;;  %vm584_vm11 = vcmp.gt.f32.partialorder %v568_v21, 0.0 }
  0xd6   : > { %v1949_v26 = vadd.f32 -1.0, %v2173_v23 }
  0xd7   : > { %2174 = vpow2.f32 %v603_v24 }
  0xd8   : > { %v627_v27 = vmul.f32 1.6732632, %v1949_v26 }
  0xda   : > { %v570_v28 = vpop.f32.mrf.mxu0  ;;  %v638_v29 = vsel %vm583_vm10, %v565_v13, %v627_v27 }
  0xdb   : > { %v571_v30 = vadd.f32 %v2394_v25, %v570_v28  ;;  %v649_v31 = vmul.f32 1.050701, %v638_v29 }
  0xdd   : > { %v2175_v32 = vpop.eup %2174  ;;  %v605_v33 = vmul.f32 1.442695, %v571_v30  ;;  %1960 = vmatmul.msk.f32.gmra.mxu1 %vm666_vm3, %v649_v31  ;;  %vm585_vm12 = vcmp.gt.f32.partialorder %v571_v30, 0.0 }
  0xde   : > { %v1950_v34 = vadd.f32 -1.0, %v2175_v32 }
  0xdf   : > { %2176 = vpow2.f32 %v605_v33 }
  0xe0   : > { %v628_v35 = vmul.f32 1.6732632, %v1950_v34 }
  0xe2   : > { %v573_v36 = vpop.f32.mrf.mxu0  ;;  %v639_v37 = vsel %vm584_vm11, %v568_v21, %v628_v35 }
  0xe3   : > { %v574_v38 = vadd.f32 %v2394_v25, %v573_v36  ;;  %v650_v39 = vmul.f32 1.050701, %v639_v37 }
  0xe5   : > { %v2177_v40 = vpop.eup %2176  ;;  %v607_v41 = vmul.f32 1.442695, %v574_v38  ;;  %1961 = vmatmul.msk.f32.gmra.mxu1 %vm666_vm3, %v650_v39  ;;  %vm586_vm13 = vcmp.gt.f32.partialorder %v574_v38, 0.0 }
  0xe6   : > { %v1951_v42 = vadd.f32 -1.0, %v2177_v40 }
  0xe7   : > { %2178 = vpow2.f32 %v607_v41 }
  0xe8   : > { %v629_v43 = vmul.f32 1.6732632, %v1951_v42 }
  0xea   : > { %v640_v44 = vsel %vm585_vm12, %v571_v30, %v629_v43  ;;  %vm832_vm12 = vcmask 662528  }
  0xeb   : > { %v651_v45 = vmul.f32 1.050701, %v640_v44 }
  0xed   : > { %v2179_v46 = vpop.eup %2178  ;;  %1962 = vmatmul.msk.f32.gmra.mxu1 %vm666_vm3, %v651_v45 }
  0xee   : > { %v1952_v47 = vadd.f32 -1.0, %v2179_v46 }
  0xf0   : > { %v630_v48 = vmul.f32 1.6732632, %v1952_v47 }
  0xf2   : > { %v641_v49 = vsel %vm586_vm13, %v574_v38, %v630_v48  ;;  %vm946_vm13 = vcmask 261120  }
  0xf3   : > { %v652_v50 = vmul.f32 1.050701, %v641_v49 }
  0xf5   : > { %1963 = vmatmul.msk.f32.gmra.mxu1 %vm666_vm3, %v652_v50 }
 0x122   : > { %v717_v25 = vpop.f32.mrf.mxu1 }
 0x123   : > { %v2440_v20 = vadd.f32 %v2155_v59, %v717_v25 }
 0x125   : > { %v761_v31 = vmul.f32 1.442695, %v2440_v20  ;;  %vm750_vm11 = vcmp.gt.f32.partialorder %v2440_v20, 0.0 }
 0x12a   : > { %v720_v51 = vpop.f32.mrf.mxu1 }
 0x12b   : > { %v2437_v16 = vadd.f32 %v2155_v59, %v720_v51 }
 0x12d   : > { %v763_v26 = vmul.f32 1.442695, %v2437_v16  ;;  %vm751_vm10 = vcmp.gt.f32.partialorder %v2437_v16, 0.0 }
 0x132   : > { %v723_v52 = vpop.f32.mrf.mxu1 }
 0x133   : > { %v2434_v13 = vadd.f32 %v2155_v59, %v723_v52 }
 0x135   : > { %v765_v21 = vmul.f32 1.442695, %v2434_v13  ;;  %vm752_vm9 = vcmp.gt.f32.partialorder %v2434_v13, 0.0 }
 0x13a   : > { %v726_v53 = vpop.f32.mrf.mxu1 }
 0x13b   : > { %v2432_v10 = vadd.f32 %v2155_v59, %v726_v53 }
 0x13d   : > { %v767_v17 = vmul.f32 1.442695, %v2432_v10  ;;  %vm753_vm8 = vcmp.gt.f32.partialorder %v2432_v10, 0.0 }
 0x142   : > { %v729_v54 = vpop.f32.mrf.mxu1 }
 0x143   : > { %v2429_v7 = vadd.f32 %v2155_v59, %v729_v54 }
 0x145   : > { %v769_v14 = vmul.f32 1.442695, %v2429_v7  ;;  %vm754_vm7 = vcmp.gt.f32.partialorder %v2429_v7, 0.0 }
 0x14a   : > { %v732_v55 = vpop.f32.mrf.mxu1 }
 0x14b   : > { %v2425_v3 = vadd.f32 %v2155_v59, %v732_v55 }
 0x14d   : > { %v771_v9 = vmul.f32 1.442695, %v2425_v3  ;;  %vm755_vm6 = vcmp.gt.f32.partialorder %v2425_v3, 0.0 }
 0x152   : > { %v735_v56 = vpop.f32.mrf.mxu1 }
 0x153   : > { %v2423_v1 = vadd.f32 %v2155_v59, %v735_v56 }
 0x155   : > { %v773_v5 = vmul.f32 1.442695, %v2423_v1  ;;  %vm756_vm5 = vcmp.gt.f32.partialorder %v2423_v1, 0.0 }
 0x15a   : > { %v738_v57 = vpop.f32.mrf.mxu1 }
 0x15b   : > { %v2421_v63 = vadd.f32 %v2155_v59, %v738_v57 }
 0x15d   : > { %v775_v4 = vmul.f32 1.442695, %v2421_v63  ;;  %vm757_vm4 = vcmp.gt.f32.partialorder %v2421_v63, 0.0 }
 0x162   : > { %v741_v58 = vpop.f32.mrf.mxu1 }
 0x163   : > { %v742_v61 = vadd.f32 %v2155_v59, %v741_v58 }
 0x165   : > { %v777_v2 = vmul.f32 1.442695, %v742_v61  ;;  %vm758_vm3 = vcmp.gt.f32.partialorder %v742_v61, 0.0 }
 0x16a   : > { %v744_v60 = vpop.f32.mrf.mxu1 }
 0x16b   : > { %v745_v62 = vadd.f32 %v2155_v59, %v744_v60 }
 0x16d   : > { %v779_v0 = vmul.f32 1.442695, %v745_v62  ;;  %vm759_vm14 = vcmp.gt.f32.partialorder %v745_v62, 0.0 }
 0x16f   : > { %2180 = vpow2.f32 %v779_v0 }
 0x170   : > { %2182 = vpow2.f32 %v777_v2 }
 0x171   : > { %2184 = vpow2.f32 %v775_v4 }
 0x172   : > { %v747_v6 = vpop.f32.mrf.mxu1  ;;  %2186 = vpow2.f32 %v773_v5 }
 0x173   : > { %v748_v8 = vadd.f32 %v2155_v59, %v747_v6 }
 0x175   : > { %v781_v11 = vmul.f32 1.442695, %v748_v8  ;;  %v2181_v12 = vpop.eup %2180  ;;  %vm760_vm15 = vcmp.gt.f32.partialorder %v748_v8, 0.0 }
 0x176   : > { %v2183_v15 = vpop.eup %2182  ;;  %v1973_v18 = vadd.f32 -1.0, %v2181_v12  ;;  %v2472_v12 = vld [vmem:[%s2912_s5 + $0x28] sm:$0xff] }
 0x177   : > { %2188 = vpow2.f32 %v781_v11  ;;  %v2185_v19 = vpop.eup %2184  ;;  %v1972_v23 = vadd.f32 -1.0, %v2183_v15  ;;  %v2467_v11 = vld [vmem:[%s2912_s5] sm:$0xff]  ;;  %v887_v15 = vld [vmem:[%s2913_s6 + $0x18] sm:$0xff] }
 0x178   : > { %2190 = vpow2.f32 %v771_v9  ;;  %v2187_v22 = vpop.eup %2186  ;;  %v1971_v28 = vadd.f32 -1.0, %v2185_v19  ;;  %v803_v29 = vmul.f32 1.6732632, %v1973_v18  ;;  %v1993_v18 = vld [vmem:[%s2913_s6 + $0x28] sm:$0xff] }
 0x179   : > { %2192 = vpow2.f32 %v769_v14  ;;  %v1970_v32 = vadd.f32 -1.0, %v2187_v22  ;;  %v802_v33 = vmul.f32 1.6732632, %v1972_v23  ;;  %v1995_v14 = vld [vmem:[%s2913_s6 + $0x38] sm:$0xff]  ;;  %v2503_v19 = vld [vmem:[%s2912_s5 + $0x8] sm:$0xff]  ;;  %v2527_v23 = vld [vmem:[%s2912_s5 + $0x10] sm:$0xff] }
 0x17a   : > { %2194 = vpow2.f32 %v767_v17  ;;  %v801_v37 = vmul.f32 1.6732632, %v1971_v28  ;;  %v814_v39 = vsel %vm759_vm14, %v745_v62, %v803_v29  ;;  %v886_v17 = vld [vmem:[%s2913_s6 + $0x10] sm:$0xff]  ;;  %v2516_v22 = vld [vmem:[%s2912_s5 + $0x58] sm:$0xff]  ;;  %v2553_v28 = vld [vmem:[%s2912_s5 + $0x40] sm:$0xff] }
 0x17b   : > { %2196 = vpow2.f32 %v765_v21  ;;  %v813_v43 = vsel %vm758_vm3, %v742_v61, %v802_v33  ;;  %v800_v44 = vmul.f32 1.6732632, %v1970_v32  ;;  %v825_v46 = vmul.f32 1.050701, %v814_v39  ;;  %v2511_v21 = vld [vmem:[%s2912_s5 + $0x30] sm:$0xff]  ;;  %v2558_v29 = vld [vmem:[%s2912_s5 + $0x68] sm:$0xff] }
 0x17c   : > { %2198 = vpow2.f32 %v763_v26  ;;  %v812_v48 = vsel %vm757_vm4, %v2421_v63, %v801_v37  ;;  %v824_v25 = vmul.f32 1.050701, %v813_v43  ;;  %v2537_v26 = vld [vmem:[%s2912_s5 + $0x60] sm:$0xff]  ;;  %v2579_v32 = vld [vmem:[%s2912_s5 + $0x70] sm:$0xf]  ;;  %v2020_v37 = vld [vmem:[%s2913_s6 + $0x58] sm:$0xff] }
 0x17d   : > { %v2189_v24 = vpop.eup %2188  ;;  %2200 = vpow2.f32 %v761_v31  ;;  %v811_v52 = vsel %vm756_vm5, %v2423_v1, %v800_v44  ;;  %v823_v55 = vmul.f32 1.050701, %v812_v48  ;;  %v2574_v31 = vld [vmem:[%s2912_s5 + $0x48] sm:$0xf]  ;;  %v1992_v33 = vld [vmem:[%s2913_s6 + $0x20] sm:$0xff] }
 0x17e   : > { %v2191_v27 = vpop.eup %2190  ;;  %v1974_v30 = vadd.f32 -1.0, %v2189_v24  ;;  %v822_v59 = vmul.f32 1.050701, %v811_v52  ;;  %v2532_v24 = vld [vmem:[%s2912_s5 + $0x38] sm:$0xff]  ;;  %v2018_v39 = vld [vmem:[%s2913_s6 + $0x48] sm:$0xff] }
 0x17f   : > { %v2193_v35 = vpop.eup %2192  ;;  %v1969_v36 = vadd.f32 -1.0, %v2191_v27  ;;  %v2548_v27 = vld [vmem:[%s2912_s5 + $0x18] sm:$0xff] }
 0x180   : > { %v804_v34 = vmul.f32 1.6732632, %v1974_v30  ;;  %v2195_v40 = vpop.eup %2194  ;;  %v1968_v42 = vadd.f32 -1.0, %v2193_v35  ;;  %v2569_v30 = vld [vmem:[%s2912_s5 + $0x20] sm:$0xf] }
 0x181   : > { %v2197_v45 = vpop.eup %2196  ;;  %v1967_v47 = vadd.f32 -1.0, %v2195_v40  ;;  %v799_v49 = vmul.f32 1.6732632, %v1969_v36  ;;  %v2017_v40 = vld [vmem:[%s2913_s6 + $0x40] sm:$0xff] }
 0x182   : > { %v815_v38 = vsel %vm760_vm15, %v748_v8, %v804_v34  ;;  %v2199_v50 = vpop.eup %2198  ;;  %v1966_v51 = vadd.f32 -1.0, %v2197_v45  ;;  %v798_v53 = vmul.f32 1.6732632, %v1968_v42  ;;  %v884_v34 = vld [vmem:[%s2913_s6] sm:$0xff] }
 0x183   : > { %v826_v41 = vmul.f32 1.050701, %v815_v38  ;;  %v2201_v54 = vpop.eup %2200  ;;  %v1965_v56 = vadd.f32 -1.0, %v2199_v50  ;;  %v810_v57 = vsel %vm755_vm6, %v2425_v3, %v799_v49  ;;  %v797_v58 = vmul.f32 1.6732632, %v1967_v47  ;;  %v2019_v38 = vld [vmem:[%s2913_s6 + $0x50] sm:$0xff] }
 0x184   : > { %v1964_v60 = vadd.f32 -1.0, %v2201_v54  ;;  %v809_v61 = vsel %vm754_vm7, %v2429_v7, %v798_v53  ;;  %v796_v62 = vmul.f32 1.6732632, %v1966_v51  ;;  %v821_v63 = vmul.f32 1.050701, %v810_v57 }
 0x185   : > { %1975 = vmatpush.msk.msra.mxu2 %vm848_vm2, %v826_v41  ;;  %1986 = vmatpush.msk.msra.mxu3 %vm848_vm2, %v826_v41  ;;  %v808_v0 = vsel %vm753_vm8, %v2432_v10, %v797_v58  ;;  %v795_v1 = vmul.f32 1.6732632, %v1965_v56  ;;  %v820_v2 = vmul.f32 1.050701, %v809_v61  ;;  %vm1864_vm6 = vcmask 392192  }
 0x186   : > { %2011 = vmatpush.msk.msrb.mxu0 %vm848_vm2, %v826_v41  ;;  %v807_v3 = vsel %vm752_vm9, %v2434_v13, %v796_v62  ;;  %v794_v4 = vmul.f32 1.6732632, %v1964_v60  ;;  %v819_v5 = vmul.f32 1.050701, %v808_v0  ;;  %v2481_v13 = vld [vmem:[%s2912_s5 + $0x50] sm:$0xff] }
 0x187   : > { %858 = vmatpush.msra.mxu2 %v825_v46  ;;  %915 = vmatpush.msra.mxu3 %v825_v46  ;;  %v806_v6 = vsel %vm751_vm10, %v2437_v16, %v795_v1  ;;  %v818_v7 = vmul.f32 1.050701, %v807_v3  ;;  %v1994_v16 = vld [vmem:[%s2913_s6 + $0x30] sm:$0xff] }
 0x188   : > { %1068 = vmatpush.msrb.mxu0 %v825_v46  ;;  %v805_v8 = vsel %vm750_vm11, %v2440_v20, %v794_v4  ;;  %v817_v9 = vmul.f32 1.050701, %v806_v6  ;;  %v885_v20 = vld [vmem:[%s2913_s6 + $0x8] sm:$0xff] }
 0x189   : > { %859 = vmatpush.msra.mxu2 %v824_v25  ;;  %916 = vmatpush.msra.mxu3 %v824_v25  ;;  %v816_v10 = vmul.f32 1.050701, %v805_v8 }
 0x18a   : > { %1069 = vmatpush.msrb.mxu0 %v824_v25 }
 0x18b   : > { %860 = vmatpush.msra.mxu2 %v823_v55  ;;  %917 = vmatpush.msra.mxu3 %v823_v55 }
 0x18c   : > { %1070 = vmatpush.msrb.mxu0 %v823_v55 }
 0x18d   : > { %861 = vmatpush.msra.mxu2 %v822_v59  ;;  %918 = vmatpush.msra.mxu3 %v822_v59 }
 0x18e   : > { %1071 = vmatpush.msrb.mxu0 %v822_v59 }
 0x18f   : > { %862 = vmatpush.msra.mxu2 %v821_v63  ;;  %919 = vmatpush.msra.mxu3 %v821_v63 }
 0x190   : > { %1072 = vmatpush.msrb.mxu0 %v821_v63 }
 0x191   : > { %863 = vmatpush.msra.mxu2 %v820_v2  ;;  %920 = vmatpush.msra.mxu3 %v820_v2 }
 0x192   : > { %1073 = vmatpush.msrb.mxu0 %v820_v2 }
 0x193   : > { %864 = vmatpush.msra.mxu2 %v819_v5  ;;  %921 = vmatpush.msra.mxu3 %v819_v5 }
 0x194   : > { %1074 = vmatpush.msrb.mxu0 %v819_v5 }
 0x195   : > { %865 = vmatpush.msra.mxu2 %v818_v7  ;;  %922 = vmatpush.msra.mxu3 %v818_v7 }
 0x196   : > { %1075 = vmatpush.msrb.mxu0 %v818_v7  ;;  %v2156_v7 = vld [vmem:[%s2914_s7] ss:$0 sm:$0xff] }
 0x197   : > { %866 = vmatpush.msra.mxu2 %v817_v9  ;;  %923 = vmatpush.msra.mxu3 %v817_v9 }
 0x198   : > { %1076 = vmatpush.msrb.mxu0 %v817_v9 }
 0x199   : > { %867 = vmatpush.msra.mxu2 %v816_v10  ;;  %924 = vmatpush.msra.mxu3 %v816_v10 }
 0x19a   : > { %1077 = vmatpush.msrb.mxu0 %v816_v10  ;;  %1976 = vmatmul.msk.f32.vlgmr.msra.gmra.mxu2 %vm832_vm12, %v2467_v11 }
 0x19b   : > { %1987 = vmatmul.msk.f32.vlgmr.msra.gmra.mxu3 %vm832_vm12, %v2472_v12  ;;  %2012 = vmatmul.msk.f32.vlgmr.msrb.gmra.mxu0 %vm832_vm12, %v2481_v13 }
 0x19c   : > { %974 = vmatpush.msrb.mxu2 %v1995_v14  ;;  %1021 = vmatpush.msrb.mxu3 %v887_v15 }
 0x19e   : > { %975 = vmatpush.msrb.mxu2 %v1994_v16  ;;  %1022 = vmatpush.msrb.mxu3 %v886_v17 }
 0x1a0   : > { %976 = vmatpush.msrb.mxu2 %v1993_v18  ;;  %1023 = vmatpush.msrb.mxu3 %v885_v20 }
 0x1a2   : > { %1977 = vmatmul.msk.f32.gmra.mxu2 %vm832_vm12, %v2503_v19  ;;  %1024 = vmatpush.msrb.mxu3 %v884_v34 }
 0x1a3   : > { %1988 = vmatmul.msk.f32.gmra.mxu3 %vm832_vm12, %v2511_v21  ;;  %2013 = vmatmul.msk.f32.gmra.mxu0 %vm832_vm12, %v2516_v22 }
 0x1a4   : > { %977 = vmatpush.msrb.mxu2 %v1992_v33 }
 0x1a6   : > { %1126 = vmatpush.msra.mxu2 %v2020_v37 }
 0x1a8   : > { %1127 = vmatpush.msra.mxu2 %v2019_v38 }
 0x1aa   : > { %1978 = vmatmul.msk.f32.gmra.mxu2 %vm832_vm12, %v2527_v23 }
 0x1ab   : > { %1989 = vmatmul.msk.f32.gmra.mxu3 %vm832_vm12, %v2532_v24  ;;  %2014 = vmatmul.msk.f32.gmra.mxu0 %vm832_vm12, %v2537_v26 }
 0x1ac   : > { %1128 = vmatpush.msra.mxu2 %v2018_v39 }
 0x1ae   : > { %1129 = vmatpush.msra.mxu2 %v2017_v40 }
 0x1b2   : > { %1979 = vmatmul.msk.f32.gmra.mxu2 %vm832_vm12, %v2548_v27 }
 0x1b3   : > { %1990 = vmatmul.msk.f32.gmra.mxu3 %vm832_vm12, %v2553_v28  ;;  %2015 = vmatmul.msk.f32.gmra.mxu0 %vm832_vm12, %v2558_v29 }
 0x1ba   : > { %1980 = vmatmul.msk.f32.gmra.mxu2 %vm832_vm12, %v2569_v30 }
 0x1bb   : > { %1991 = vmatmul.msk.f32.gmra.mxu3 %vm832_vm12, %v2574_v31  ;;  %2016 = vmatmul.msk.f32.gmra.mxu0 %vm832_vm12, %v2579_v32 }
 0x218   : > { %v1079_v47 = vpop.f32.mrf.mxu0 }
 0x21d   : > { %v869_v35 = vpop.f32.mrf.mxu2 }
 0x21e   : > { %v926_v36 = vpop.f32.mrf.mxu3  ;;  %2001 = vmatmul.msk.f32.vlgmr.msrb.gmra.mxu3 %vm946_vm13, %v869_v35 }
 0x21f   : > { %1996 = vmatmul.msk.f32.vlgmr.msrb.gmra.mxu2 %vm946_vm13, %v926_v36 }
 0x220   : > { %v1082_v50 = vpop.f32.mrf.mxu0 }
 0x225   : > { %v872_v41 = vpop.f32.mrf.mxu2 }
 0x226   : > { %v929_v42 = vpop.f32.mrf.mxu3  ;;  %2002 = vmatmul.msk.f32.gmra.mxu3 %vm946_vm13, %v872_v41 }
 0x227   : > { %1997 = vmatmul.msk.f32.gmra.mxu2 %vm946_vm13, %v929_v42 }
 0x228   : > { %v1085_v25 = vpop.f32.mrf.mxu0 }
 0x22d   : > { %v875_v43 = vpop.f32.mrf.mxu2 }
 0x22e   : > { %v932_v44 = vpop.f32.mrf.mxu3  ;;  %2003 = vmatmul.msk.f32.gmra.mxu3 %vm946_vm13, %v875_v43 }
 0x22f   : > { %1998 = vmatmul.msk.f32.gmra.mxu2 %vm946_vm13, %v932_v44 }
 0x230   : > { %v1088_v51 = vpop.f32.mrf.mxu0 }
 0x235   : > { %v878_v45 = vpop.f32.mrf.mxu2 }
 0x236   : > { %v935_v46 = vpop.f32.mrf.mxu3  ;;  %2004 = vmatmul.msk.f32.gmra.mxu3 %vm946_vm13, %v878_v45 }
 0x237   : > { %1999 = vmatmul.msk.f32.gmra.mxu2 %vm946_vm13, %v935_v46 }
 0x238   : > { %v1091_v52 = vpop.f32.mrf.mxu0 }
 0x23d   : > { %v881_v48 = vpop.f32.mrf.mxu2 }
 0x23e   : > { %v938_v49 = vpop.f32.mrf.mxu3  ;;  %2005 = vmatmul.msk.f32.gmra.mxu3 %vm946_vm13, %v881_v48 }
 0x23f   : > { %2000 = vmatmul.msk.f32.gmra.mxu2 %vm946_vm13, %v938_v49 }
 0x247   : > { %2021 = vmatmul.msk.f32.vlgmr.msra.gmra.mxu2 %vm946_vm13, %v1079_v47 }
 0x24f   : > { %2022 = vmatmul.msk.f32.gmra.mxu2 %vm946_vm13, %v1082_v50 }
 0x257   : > { %2023 = vmatmul.msk.f32.gmra.mxu2 %vm946_vm13, %v1085_v25 }
 0x25f   : > { %2024 = vmatmul.msk.f32.gmra.mxu2 %vm946_vm13, %v1088_v51 }
 0x267   : > { %2025 = vmatmul.msk.f32.gmra.mxu2 %vm946_vm13, %v1091_v52 }
 0x2a1   : > { %v1026_v57 = vpop.f32.mrf.mxu3 }
 0x2a2   : > { %v979_v53 = vpop.f32.mrf.mxu2 }
 0x2a3   : > { %v1027_v5 = vadd.f32 %v1026_v57, %v979_v53 }
 0x2a9   : > { %v1029_v59 = vpop.f32.mrf.mxu3 }
 0x2aa   : > { %v982_v54 = vpop.f32.mrf.mxu2 }
 0x2ab   : > { %v1030_v2 = vadd.f32 %v1029_v59, %v982_v54 }
 0x2b1   : > { %v1032_v61 = vpop.f32.mrf.mxu3 }
 0x2b2   : > { %v985_v55 = vpop.f32.mrf.mxu2 }
 0x2b3   : > { %v1033_v1 = vadd.f32 %v1032_v61, %v985_v55 }
 0x2b9   : > { %v1035_v0 = vpop.f32.mrf.mxu3 }
 0x2ba   : > { %v988_v56 = vpop.f32.mrf.mxu2 }
 0x2bb   : > { %v1036_v3 = vadd.f32 %v1035_v0, %v988_v56 }
 0x2c1   : > { %v1038_v16 = vpop.f32.mrf.mxu3 }
 0x2c2   : > { %v991_v58 = vpop.f32.mrf.mxu2 }
 0x2c3   : > { %v1039_v33 = vadd.f32 %v1038_v16, %v991_v58  ;;  %v2076_v16 = vld [vmem:[%s2918_s11 + $0x48] sm:$0xf] }
 0x2c4   : > { %2077 = vmatpush.msk.msrb.mxu2 %vm522_vm0, %v2076_v16 }
 0x2ca   : > { %v1131_v60 = vpop.f32.mrf.mxu2 }
 0x2cb   : > { %v1146_v10 = vadd.f32 %v1131_v60, %v1027_v5  ;;  %v2645_v5 = vld [vmem:[%s2915_s8 + $0x8] sm:$0xff] }
 0x2cd   : > { %v1155_v20 = vadd.f32 %v2156_v7, %v1146_v10  ;;  %v1231_v10 = vld [vmem:[%s2916_s9 + $0x10] sm:$0xff] }
 0x2cf   : > { %v1165_v38 = vmul.f32 1.442695, %v1155_v20  ;;  %vm1160_vm5 = vcmp.gt.f32.partialorder %v1155_v20, 0.0 }
 0x2d2   : > { %v1134_v62 = vpop.f32.mrf.mxu2 }
 0x2d3   : > { %v1147_v8 = vadd.f32 %v1134_v62, %v1030_v2  ;;  %v2632_v2 = vld [vmem:[%s2915_s8 + $0x10] sm:$0xff] }
 0x2d5   : > { %v1156_v17 = vadd.f32 %v2156_v7, %v1147_v8  ;;  %v2662_v8 = vld [vmem:[%s2915_s8 + $0x18] sm:$0xff] }
 0x2d7   : > { %v1167_v36 = vmul.f32 1.442695, %v1156_v17  ;;  %vm1161_vm4 = vcmp.gt.f32.partialorder %v1156_v17, 0.0 }
 0x2da   : > { %v1137_v63 = vpop.f32.mrf.mxu2 }
 0x2db   : > { %v1148_v4 = vadd.f32 %v1137_v63, %v1033_v1  ;;  %v2042_v1 = vld [vmem:[%s2916_s9 + $0x38] sm:$0xff] }
 0x2dd   : > { %v1157_v14 = vadd.f32 %v2156_v7, %v1148_v4  ;;  %v2041_v4 = vld [vmem:[%s2916_s9 + $0x30] sm:$0xff] }
 0x2df   : > { %v1169_v34 = vmul.f32 1.442695, %v1157_v14  ;;  %vm1162_vm3 = vcmp.gt.f32.partialorder %v1157_v14, 0.0 }
 0x2e2   : > { %v1140_v6 = vpop.f32.mrf.mxu2 }
 0x2e3   : > { %v1149_v9 = vadd.f32 %v1140_v6, %v1036_v3  ;;  %v2637_v3 = vld [vmem:[%s2915_s8] sm:$0xff]  ;;  %v2040_v6 = vld [vmem:[%s2916_s9 + $0x28] sm:$0xff] }
 0x2e5   : > { %v1158_v15 = vadd.f32 %v2156_v7, %v1149_v9  ;;  %v1232_v9 = vld [vmem:[%s2916_s9 + $0x18] sm:$0xff] }
 0x2e7   : > { %v1171_v18 = vmul.f32 1.442695, %v1158_v15  ;;  %vm1163_vm14 = vcmp.gt.f32.partialorder %v1158_v15, 0.0 }
 0x2e9   : > { %2202 = vpow2.f32 %v1171_v18  ;;  %v2074_v18 = vld [vmem:[%s2918_s11 + $0x38] sm:$0xff] }
 0x2ea   : > { %v1143_v35 = vpop.f32.mrf.mxu2  ;;  %2204 = vpow2.f32 %v1169_v34  ;;  %v1419_v34 = vld [vmem:[%s2918_s11 + $0x18] sm:$0xff] }
 0x2eb   : > { %v1150_v37 = vadd.f32 %v1143_v35, %v1039_v33  ;;  %2206 = vpow2.f32 %v1167_v36  ;;  %v2073_v33 = vld [vmem:[%s2918_s11 + $0x30] sm:$0xff]  ;;  %v2072_v35 = vld [vmem:[%s2918_s11 + $0x28] sm:$0xff] }
 0x2ec   : > { %2208 = vpow2.f32 %v1165_v38  ;;  %v1418_v36 = vld [vmem:[%s2918_s11 + $0x10] sm:$0xff]  ;;  %v2216_v38 = vld [vmem:[%s2340_s28] sm:$0xff] }
 0x2ed   : > { %v1159_v39 = vadd.f32 %v2156_v7, %v1150_v37  ;;  %v2039_v7 = vld [vmem:[%s2916_s9 + $0x20] sm:$0xff]  ;;  %v2093_v37 = vld [vmem:[%s2918_s11 + $0x70] sm:$0xf] }
 0x2ef   : > { %v1173_v40 = vmul.f32 1.442695, %v1159_v39  ;;  %v2203_v41 = vpop.eup %2202  ;;  %vm1164_vm15 = vcmp.gt.f32.partialorder %v1159_v39, 0.0 }
 0x2f0   : > { %v2205_v42 = vpop.eup %2204  ;;  %v2029_v43 = vadd.f32 -1.0, %v2203_v41  ;;  %v2092_v41 = vld [vmem:[%s2918_s11 + $0x68] sm:$0xff] }
 0x2f1   : > { %2210 = vpow2.f32 %v1173_v40  ;;  %v2207_v44 = vpop.eup %2206  ;;  %v2028_v46 = vadd.f32 -1.0, %v2205_v42  ;;  %v1417_v42 = vld [vmem:[%s2918_s11 + $0x8] sm:$0xff] }
 0x2f2   : > { %v2209_v45 = vpop.eup %2208  ;;  %v2027_v48 = vadd.f32 -1.0, %v2207_v44  ;;  %v1183_v49 = vmul.f32 1.6732632, %v2029_v43  ;;  %v1416_v43 = vld [vmem:[%s2918_s11] sm:$0xff] }
 0x2f3   : > { %v2026_v25 = vadd.f32 -1.0, %v2209_v45  ;;  %v1182_v51 = vmul.f32 1.6732632, %v2028_v46  ;;  %v2091_v44 = vld [vmem:[%s2918_s11 + $0x60] sm:$0xff]  ;;  %v2090_v45 = vld [vmem:[%s2918_s11 + $0x58] sm:$0xff]  ;;  %v2089_v46 = vld [vmem:[%s2918_s11 + $0x50] sm:$0xff] }
 0x2f4   : > { %v1181_v53 = vmul.f32 1.6732632, %v2027_v48  ;;  %v1188_v54 = vsel %vm1163_vm14, %v1158_v15, %v1183_v49  ;;  %v1229_v15 = vld [vmem:[%s2916_s9] sm:$0xff] }
 0x2f5   : > { %v1180_v57 = vmul.f32 1.6732632, %v2026_v25  ;;  %v1187_v58 = vsel %vm1162_vm3, %v1157_v14, %v1182_v51  ;;  %v1193_v59 = vmul.f32 1.050701, %v1188_v54  ;;  %v1230_v14 = vld [vmem:[%s2916_s9 + $0x8] sm:$0xff]  ;;  %v2218_v25 = vld [vmem:[%s2340_s28 + $0x10] sm:$0xff] }
 0x2f6   : > { %v1186_v60 = vsel %vm1161_vm4, %v1156_v17, %v1181_v53  ;;  %v1192_v61 = vmul.f32 1.050701, %v1187_v58  ;;  %v2075_v17 = vld [vmem:[%s2918_s11 + $0x40] sm:$0xff]  ;;  %v2748_v51 = vld [vmem:[%s2915_s8 + $0x28] sm:$0xff] }
 0x2f7   : > { %v2211_v47 = vpop.eup %2210  ;;  %v1185_v62 = vsel %vm1160_vm5, %v1155_v20, %v1180_v57  ;;  %v1191_v63 = vmul.f32 1.050701, %v1186_v60  ;;  %1495 = vmatpush.msrb.mxu2 %v2075_v17  ;;  %v1420_v20 = vld [vmem:[%s2918_s11 + $0x20] sm:$0xf]  ;;  %v2221_v54 = vld [vmem:[%s2340_s28 + $0x28] sm:$0xff]  ;;  %v2055_v60 = vld [vmem:[%s2916_s9 + $0x58] sm:$0xff] }
 0x2f8   : > { %v2030_v50 = vadd.f32 -1.0, %v2211_v47  ;;  %v1190_v0 = vmul.f32 1.050701, %v1185_v62  ;;  %v2217_v47 = vld [vmem:[%s2340_s28 + $0x8] sm:$0xff]  ;;  %v2220_v53 = vld [vmem:[%s2340_s28 + $0x20] sm:$0xff] }
 0x2f9   : > { %1496 = vmatpush.msrb.mxu2 %v2074_v18  ;;  %v2224_v57 = vld [vmem:[%s2340_s28 + $0x40] sm:$0xff]  ;;  %v2225_v58 = vld [vmem:[%s2340_s28 + $0x48] sm:$0xff] }
 0x2fa   : > { %v1184_v52 = vmul.f32 1.6732632, %v2030_v50  ;;  %v2738_v50 = vld [vmem:[%s2915_s8 + $0x20] sm:$0xff]  ;;  %v2053_v62 = vld [vmem:[%s2916_s9 + $0x48] sm:$0xff] }
 0x2fb   : > { %1497 = vmatpush.msrb.mxu2 %v2073_v33 }
 0x2fc   : > { %v1189_v55 = vsel %vm1164_vm15, %v1159_v39, %v1184_v52  ;;  %v2219_v52 = vld [vmem:[%s2340_s28 + $0x18] sm:$0xff] }
 0x2fd   : > { %v1194_v56 = vmul.f32 1.050701, %v1189_v55  ;;  %1498 = vmatpush.msrb.mxu2 %v2072_v35  ;;  %v2222_v55 = vld [vmem:[%s2340_s28 + $0x30] sm:$0xff] }
 0x2fe   : > { %2078 = vmatmul.msk.f32.vlgmr.msrb.gmra.mxu2 %vm488_vm1, %v2216_v38 }
 0x2ff   : > { %2031 = vmatpush.msk.msra.mxu0 %vm522_vm0, %v1194_v56  ;;  %2140 = vmatpush.msk.msra.mxu3 %vm522_vm0, %v1194_v56 }
 0x300   : > { %2036 = vmatpush.msk.msrb.mxu1 %vm522_vm0, %v1194_v56 }
 0x301   : > { %1218 = vmatpush.msra.mxu0 %v1193_v59  ;;  %2141 = vmatpush.msra.mxu3 %v1193_v59 }
 0x302   : > { %1254 = vmatpush.msrb.mxu1 %v1193_v59 }
 0x303   : > { %1219 = vmatpush.msra.mxu0 %v1192_v61  ;;  %2142 = vmatpush.msra.mxu3 %v1192_v61 }
 0x304   : > { %1255 = vmatpush.msrb.mxu1 %v1192_v61 }
 0x305   : > { %1220 = vmatpush.msra.mxu0 %v1191_v63  ;;  %2143 = vmatpush.msra.mxu3 %v1191_v63 }
 0x306   : > { %1256 = vmatpush.msrb.mxu1 %v1191_v63  ;;  %2079 = vmatmul.msk.f32.gmra.mxu2 %vm488_vm1, %v2217_v47 }
 0x307   : > { %1221 = vmatpush.msra.mxu0 %v1190_v0  ;;  %2144 = vmatpush.msra.mxu3 %v1190_v0 }
 0x308   : > { %1257 = vmatpush.msrb.mxu1 %v1190_v0  ;;  %2032 = vmatmul.msk.f32.vlgmr.msra.gmra.mxu0 %vm488_vm1, %v2637_v3 }
 0x309   : > { %1288 = vmatpush.msrb.mxu3 %v2042_v1  ;;  %2037 = vmatmul.msk.f32.vlgmr.msrb.gmra.mxu1 %vm488_vm1, %v2632_v2 }
 0x30a   : > { %2033 = vmatmul.msk.f32.vlgmr.msra.gmra.mxu3 %vm488_vm1, %v2645_v5  ;;  %1317 = vmatpush.msra.mxu1 %v1232_v9 }
 0x30b   : > { %1289 = vmatpush.msrb.mxu3 %v2041_v4  ;;  %1383 = vmatpush.msrb.mxu0 %v2055_v60 }
 0x30c   : > { %1318 = vmatpush.msra.mxu1 %v1231_v10 }
 0x30d   : > { %1290 = vmatpush.msrb.mxu3 %v2040_v6 }
 0x30e   : > { %1319 = vmatpush.msra.mxu1 %v1230_v14  ;;  %2080 = vmatmul.msk.f32.gmra.mxu2 %vm488_vm1, %v2218_v25 }
 0x30f   : > { %1291 = vmatpush.msrb.mxu3 %v2039_v7 }
 0x310   : > { %1320 = vmatpush.msra.mxu1 %v1229_v15 }
 0x311   : > { %2049 = vmatpush.msk.msra.mxu3 %vm522_vm0, %v1194_v56  ;;  %2038 = vmatmul.msk.f32.gmra.mxu1 %vm488_vm1, %v2662_v8  ;;  %v2223_v56 = vld [vmem:[%s2340_s28 + $0x38] sm:$0xff] }
 0x312   : > { %2060 = vmatpush.msk.msrb.mxu1 %vm522_vm0, %v1420_v20 }
 0x313   : > { %1349 = vmatpush.msra.mxu3 %v1193_v59  ;;  %v2226_v59 = vld [vmem:[%s2340_s28 + $0x50] sm:$0x1] }
 0x314   : > { %1436 = vmatpush.msrb.mxu1 %v1419_v34 }
 0x315   : > { %1350 = vmatpush.msra.mxu3 %v1192_v61  ;;  %v2054_v61 = vld [vmem:[%s2916_s9 + $0x50] sm:$0xff] }
 0x316   : > { %1437 = vmatpush.msrb.mxu1 %v1418_v36  ;;  %2081 = vmatmul.msk.f32.gmra.mxu2 %vm488_vm1, %v2219_v52 }
 0x317   : > { %1351 = vmatpush.msra.mxu3 %v1191_v63  ;;  %1384 = vmatpush.msrb.mxu0 %v2054_v61  ;;  %v2052_v63 = vld [vmem:[%s2916_s9 + $0x40] sm:$0xff] }
 0x318   : > { %1438 = vmatpush.msrb.mxu1 %v1417_v42 }
 0x319   : > { %1352 = vmatpush.msra.mxu3 %v1190_v0  ;;  %1385 = vmatpush.msrb.mxu0 %v2053_v62 }
 0x31a   : > { %1439 = vmatpush.msrb.mxu1 %v1416_v43 }
 0x31b   : > { %1386 = vmatpush.msrb.mxu0 %v2052_v63 }
 0x31e   : > { %2082 = vmatmul.msk.f32.gmra.mxu2 %vm488_vm1, %v2220_v53 }
 0x326   : > { %2083 = vmatmul.msk.f32.gmra.mxu2 %vm488_vm1, %v2221_v54 }
 0x32e   : > { %2084 = vmatmul.msk.f32.gmra.mxu2 %vm488_vm1, %v2222_v55 }
 0x336   : > { %2085 = vmatmul.msk.f32.gmra.mxu2 %vm488_vm1, %v2223_v56 }
 0x33e   : > { %2086 = vmatmul.msk.f32.gmra.mxu2 %vm488_vm1, %v2224_v57 }
 0x346   : > { %2087 = vmatmul.msk.f32.gmra.mxu2 %vm488_vm1, %v2225_v58 }
 0x34e   : > { %2088 = vmatmul.msk.f32.gmra.mxu2 %vm488_vm1, %v2226_v59 }
 0x381   : > { %v1500_v7 = vpop.f32.mrf.mxu2 }
 0x385   : > { %v1223_v40 = vpop.f32.mrf.mxu0 }
 0x386   : > { %v1259_v39 = vpop.f32.mrf.mxu1  ;;  %2045 = vmatmul.msk.f32.vlgmr.msra.gmra.mxu1 %vm946_vm13, %v1223_v40 }
 0x387   : > { %2043 = vmatmul.msk.f32.vlgmr.msrb.gmra.mxu3 %vm946_vm13, %v1259_v39 }
 0x388   : > { %2094 = vmatpush.msk.msrb.mxu3 %vm522_vm0, %v2093_v37 }
 0x389   : > { %v1503_v16 = vpop.f32.mrf.mxu2 }
 0x38a   : > { %1565 = vmatpush.msrb.mxu3 %v2092_v41 }
 0x38c   : > { %1566 = vmatpush.msrb.mxu3 %v2091_v44 }
 0x38d   : > { %v1226_v49 = vpop.f32.mrf.mxu3 }
 0x38e   : > { %v1262_v48 = vpop.f32.mrf.mxu1  ;;  %1567 = vmatpush.msrb.mxu3 %v2090_v45  ;;  %2046 = vmatmul.msk.f32.gmra.mxu1 %vm946_vm13, %v1226_v49 }
 0x38f   : > { %2044 = vmatmul.msk.f32.gmra.mxu3 %vm946_vm13, %v1262_v48 }
 0x390   : > { %1568 = vmatpush.msrb.mxu3 %v2089_v46 }
 0x391   : > { %v1506_v33 = vpop.f32.mrf.mxu2 }
 0x396   : > { %2061 = vmatmul.msk.f32.vlgmr.msrb.gmra.mxu1 %vm488_vm1, %v2216_v38 }
 0x397   : > { %2050 = vmatmul.msk.f32.vlgmr.msra.gmra.mxu3 %vm488_vm1, %v2738_v50 }
 0x39e   : > { %2062 = vmatmul.msk.f32.gmra.mxu1 %vm488_vm1, %v2217_v47 }
 0x39f   : > { %2051 = vmatmul.msk.f32.gmra.mxu3 %vm488_vm1, %v2748_v51 }
 0x3a6   : > { %2063 = vmatmul.msk.f32.gmra.mxu1 %vm488_vm1, %v2218_v25 }
 0x3a7   : > { %2095 = vmatmul.msk.f32.vlgmr.msrb.gmra.mxu3 %vm488_vm1, %v2216_v38  ;;  %v1509_v38 = vpop.f32.mrf.mxu2 }
 0x3ae   : > { %2064 = vmatmul.msk.f32.gmra.mxu1 %vm488_vm1, %v2219_v52 }
 0x3af   : > { %2096 = vmatmul.msk.f32.gmra.mxu3 %vm488_vm1, %v2217_v47  ;;  %v1512_v44 = vpop.f32.mrf.mxu2 }
 0x3b6   : > { %2065 = vmatmul.msk.f32.gmra.mxu1 %vm488_vm1, %v2220_v53 }
 0x3b7   : > { %2097 = vmatmul.msk.f32.gmra.mxu3 %vm488_vm1, %v2218_v25  ;;  %v1515_v48 = vpop.f32.mrf.mxu2 }
 0x3be   : > { %2066 = vmatmul.msk.f32.gmra.mxu1 %vm488_vm1, %v2221_v54 }
 0x3bf   : > { %2098 = vmatmul.msk.f32.gmra.mxu3 %vm488_vm1, %v2219_v52 }
 0x3c6   : > { %2067 = vmatmul.msk.f32.gmra.mxu1 %vm488_vm1, %v2222_v55 }
 0x3c7   : > { %2099 = vmatmul.msk.f32.gmra.mxu3 %vm488_vm1, %v2220_v53 }
 0x3ce   : > { %2068 = vmatmul.msk.f32.gmra.mxu1 %vm488_vm1, %v2223_v56 }
 0x3cf   : > { %2100 = vmatmul.msk.f32.gmra.mxu3 %vm488_vm1, %v2221_v54  ;;  %v1518_v54 = vpop.f32.mrf.mxu2 }
 0x3d6   : > { %2069 = vmatmul.msk.f32.gmra.mxu1 %vm488_vm1, %v2224_v57 }
 0x3d7   : > { %2101 = vmatmul.msk.f32.gmra.mxu3 %vm488_vm1, %v2222_v55 }
 0x3de   : > { %2070 = vmatmul.msk.f32.gmra.mxu1 %vm488_vm1, %v2225_v58 }
 0x3df   : > { %2102 = vmatmul.msk.f32.gmra.mxu3 %vm488_vm1, %v2223_v56 }
 0x3e6   : > { %2071 = vmatmul.msk.f32.gmra.mxu1 %vm488_vm1, %v2226_v59 }
 0x3e7   : > { %2103 = vmatmul.msk.f32.gmra.mxu3 %vm488_vm1, %v2224_v57  ;;  %v1521_v57 = vpop.f32.mrf.mxu2 }
 0x3ef   : > { %2104 = vmatmul.msk.f32.gmra.mxu3 %vm488_vm1, %v2225_v58  ;;  %v1524_v60 = vpop.f32.mrf.mxu2 }
 0x3f7   : > { %2105 = vmatmul.msk.f32.gmra.mxu3 %vm488_vm1, %v2226_v59  ;;  %v1527_v63 = vpop.f32.mrf.mxu2 }
 0x403   : > { %v1322_v0 = vpop.f32.mrf.mxu1 }
 0x40a   : > { %v1293_v1 = vpop.f32.mrf.mxu3 }
 0x40b   : > { %v2801_v4 = vadd.f32 %v1322_v0, %v1293_v1  ;;  %v1325_v6 = vpop.f32.mrf.mxu1 }
 0x412   : > { %v1296_v9 = vpop.f32.mrf.mxu3 }
 0x413   : > { %v2803_v10 = vadd.f32 %v1325_v6, %v1296_v9  ;;  %v1441_v14 = vpop.f32.mrf.mxu1  ;;  %v1530_v9 = vpop.f32.mrf.mxu2 }
 0x414   : > { %v1533_v15 = vmax.f32 %v1441_v14, %v1500_v7 }
 0x41a   : > { %v1354_v17 = vpop.f32.mrf.mxu3 }
 0x41b   : > { %2056 = vmatmul.msk.f32.vlgmr.msrb.gmra.mxu0 %vm946_vm13, %v1354_v17  ;;  %v1444_v18 = vpop.f32.mrf.mxu1 }
 0x41c   : > { %v1534_v20 = vmax.f32 %v1444_v18, %v1503_v16 }
 0x422   : > { %v1357_v34 = vpop.f32.mrf.mxu3 }
 0x423   : > { %2057 = vmatmul.msk.f32.gmra.mxu0 %vm946_vm13, %v1357_v34  ;;  %v1447_v35 = vpop.f32.mrf.mxu1 }
 0x424   : > { %v1535_v36 = vmax.f32 %v1447_v35, %v1506_v33 }
 0x42a   : > { %v1570_v37 = vpop.f32.mrf.mxu3 }
 0x42b   : > { %v2807_v39 = vmax.f32 %v1533_v15, %v1570_v37  ;;  %v1450_v40 = vpop.f32.mrf.mxu1 }
 0x42c   : > { %v1536_v41 = vmax.f32 %v1450_v40, %v1509_v38 }
 0x432   : > { %v1573_v42 = vpop.f32.mrf.mxu3 }
 0x433   : > { %v2809_v43 = vmax.f32 %v1534_v20, %v1573_v42  ;;  %v1453_v45 = vpop.f32.mrf.mxu1 }
 0x434   : > { %v1537_v38 = vmax.f32 %v1453_v45, %v1512_v44 }
 0x43a   : > { %v1576_v46 = vpop.f32.mrf.mxu3 }
 0x43b   : > { %v2811_v47 = vmax.f32 %v1535_v36, %v1576_v46  ;;  %v1456_v25 = vpop.f32.mrf.mxu1 }
 0x43c   : > { %v1538_v36 = vmax.f32 %v1456_v25, %v1515_v48 }
 0x442   : > { %v1579_v49 = vpop.f32.mrf.mxu3 }
 0x443   : > { %v2813_v52 = vmax.f32 %v1536_v41, %v1579_v49  ;;  %v1459_v55 = vpop.f32.mrf.mxu1 }
 0x444   : > { %v1539_v34 = vmax.f32 %v1459_v55, %v1518_v54 }
 0x44a   : > { %v1582_v53 = vpop.f32.mrf.mxu3 }
 0x44b   : > { %v1462_v58 = vpop.f32.mrf.mxu1  ;;  %v1607_v42 = vmax.f32 %v1537_v38, %v1582_v53 }
 0x44c   : > { %v1540_v20 = vmax.f32 %v1462_v58, %v1521_v57 }
 0x452   : > { %v1585_v56 = vpop.f32.mrf.mxu3 }
 0x453   : > { %v1465_v61 = vpop.f32.mrf.mxu1  ;;  %v1608_v41 = vmax.f32 %v1538_v36, %v1585_v56 }
 0x454   : > { %v1541_v17 = vmax.f32 %v1465_v61, %v1524_v60  ;;  %v1804_v60 = vld [vmem:[%s2920_s13 + $0x18] sm:$0xff] }
 0x45a   : > { %v1588_v59 = vpop.f32.mrf.mxu3 }
 0x45b   : > { %v1468_v1 = vpop.f32.mrf.mxu1  ;;  %v1609_v40 = vmax.f32 %v1539_v34, %v1588_v59 }
 0x45c   : > { %v1542_v15 = vmax.f32 %v1468_v1, %v1527_v63 }
 0x462   : > { %v1591_v62 = vpop.f32.mrf.mxu3 }
 0x463   : > { %v1471_v7 = vpop.f32.mrf.mxu1  ;;  %v1610_v37 = vmax.f32 %v1540_v20, %v1591_v62  ;;  %v1803_v62 = vld [vmem:[%s2920_s13 + $0x10] sm:$0xff] }
 0x464   : > { %v1543_v14 = vmax.f32 %v1471_v7, %v1530_v9 }
 0x46a   : > { %v1594_v0 = vpop.f32.mrf.mxu3 }
 0x46b   : > { %v1611_v35 = vmax.f32 %v1541_v17, %v1594_v0  ;;  %v1802_v0 = vld [vmem:[%s2920_s13 + $0x8] sm:$0xff] }
 0x472   : > { %v1597_v6 = vpop.f32.mrf.mxu3 }
 0x473   : > { %v1612_v33 = vmax.f32 %v1542_v15, %v1597_v6 }
 0x47a   : > { %v1600_v16 = vpop.f32.mrf.mxu3 }
 0x47b   : > { %v1613_v18 = vmax.f32 %v1543_v14, %v1600_v16 }
 0x47d   : > { %2106 = vmatpush.msk.msra.mxu0 %vm848_vm2, %v1613_v18  ;;  %2118 = vmatpush.msk.msra.mxu1 %vm848_vm2, %v1613_v18 }
 0x47f   : > { %1623 = vmatpush.msra.mxu0 %v1612_v33  ;;  %1692 = vmatpush.msra.mxu1 %v1612_v33 }
 0x481   : > { %1624 = vmatpush.msra.mxu0 %v1611_v35  ;;  %1693 = vmatpush.msra.mxu1 %v1611_v35 }
 0x483   : > { %1625 = vmatpush.msra.mxu0 %v1610_v37  ;;  %1694 = vmatpush.msra.mxu1 %v1610_v37 }
 0x485   : > { %1626 = vmatpush.msra.mxu0 %v1609_v40  ;;  %1695 = vmatpush.msra.mxu1 %v1609_v40 }
 0x487   : > { %1627 = vmatpush.msra.mxu0 %v1608_v41  ;;  %1696 = vmatpush.msra.mxu1 %v1608_v41 }
 0x489   : > { %1628 = vmatpush.msra.mxu0 %v1607_v42  ;;  %1697 = vmatpush.msra.mxu1 %v1607_v42 }
 0x48b   : > { %1629 = vmatpush.msra.mxu0 %v2813_v52  ;;  %1698 = vmatpush.msra.mxu1 %v2813_v52 }
 0x48d   : > { %1630 = vmatpush.msra.mxu0 %v2811_v47  ;;  %1699 = vmatpush.msra.mxu1 %v2811_v47 }
 0x48f   : > { %1631 = vmatpush.msra.mxu0 %v2809_v43  ;;  %1700 = vmatpush.msra.mxu1 %v2809_v43 }
 0x491   : > { %1632 = vmatpush.msra.mxu0 %v2807_v39  ;;  %1701 = vmatpush.msra.mxu1 %v2807_v39 }
 0x492   : > { %2107 = vmatmul.msk.f32.vlgmr.msra.gmra.mxu0 %vm832_vm12, %v2467_v11  ;;  %2119 = vmatmul.msk.f32.vlgmr.msra.gmra.mxu1 %vm832_vm12, %v2481_v13 }
 0x493   : > { %2112 = vmatpush.msk.msrb.mxu0 %vm848_vm2, %v1613_v18 }
 0x495   : > { %1655 = vmatpush.msrb.mxu0 %v1612_v33 }
 0x497   : > { %1656 = vmatpush.msrb.mxu0 %v1611_v35 }
 0x498   : > { %v1388_v44 = vpop.f32.mrf.mxu0 }
 0x499   : > { %v1394_v45 = vadd.f32 %v1388_v44, %v2801_v4  ;;  %1657 = vmatpush.msrb.mxu0 %v1610_v37 }
 0x49a   : > { %2108 = vmatmul.msk.f32.gmra.mxu0 %vm832_vm12, %v2503_v19  ;;  %2120 = vmatmul.msk.f32.gmra.mxu1 %vm832_vm12, %v2516_v22 }
 0x49b   : > { %1658 = vmatpush.msrb.mxu0 %v1609_v40 }
 0x49d   : > { %1659 = vmatpush.msrb.mxu0 %v1608_v41 }
 0x49f   : > { %1660 = vmatpush.msrb.mxu0 %v1607_v42 }
 0x4a0   : > { %v1391_v11 = vpop.f32.mrf.mxu0 }
 0x4a1   : > { %1661 = vmatpush.msrb.mxu0 %v2813_v52  ;;  %v1395_v52 = vadd.f32 %v1391_v11, %v2803_v10 }
 0x4a2   : > { %2109 = vmatmul.msk.f32.gmra.mxu0 %vm832_vm12, %v2527_v23  ;;  %2121 = vmatmul.msk.f32.gmra.mxu1 %vm832_vm12, %v2537_v26 }
 0x4a3   : > { %1662 = vmatpush.msrb.mxu0 %v2811_v47 }
 0x4a5   : > { %1663 = vmatpush.msrb.mxu0 %v2809_v43 }
 0x4a7   : > { %1664 = vmatpush.msrb.mxu0 %v2807_v39 }
 0x4aa   : > { %2110 = vmatmul.msk.f32.gmra.mxu0 %vm832_vm12, %v2548_v27  ;;  %2122 = vmatmul.msk.f32.gmra.mxu1 %vm832_vm12, %v2558_v29 }
 0x4b2   : > { %2111 = vmatmul.msk.f32.gmra.mxu0 %vm832_vm12, %v2569_v30  ;;  %2123 = vmatmul.msk.f32.gmra.mxu1 %vm832_vm12, %v2579_v32 }
 0x4ba   : > { %2113 = vmatmul.msk.f32.vlgmr.msrb.gmra.mxu0 %vm832_vm12, %v2472_v12 }
 0x4c2   : > { %2114 = vmatmul.msk.f32.gmra.mxu0 %vm832_vm12, %v2511_v21 }
 0x4ca   : > { %2115 = vmatmul.msk.f32.gmra.mxu0 %vm832_vm12, %v2532_v24 }
 0x4d2   : > { %2116 = vmatmul.msk.f32.gmra.mxu0 %vm832_vm12, %v2553_v28  ;;  %v2157_v28 = vld [vmem:[%s2917_s10] ss:$0 sm:$0xff] }
 0x4d3   : > { %v1400_v39 = vadd.f32 %v2157_v28, %v1394_v45  ;;  %v1401_v57 = vadd.f32 %v2157_v28, %v1395_v52 }
 0x4d5   : > { %v1404_v25 = vmul.f32 1.442695, %v1400_v39  ;;  %v1406_v59 = vmul.f32 1.442695, %v1401_v57  ;;  %vm1403_vm2 = vcmp.gt.f32.partialorder %v1401_v57, 0.0 }
 0x4d7   : > { %2212 = vpow2.f32 %v1404_v25 }
 0x4d8   : > { %2214 = vpow2.f32 %v1406_v59 }
 0x4da   : > { %2117 = vmatmul.msk.f32.gmra.mxu0 %vm832_vm12, %v2574_v31 }
 0x4dd   : > { %v2213_v61 = vpop.eup %2212 }
 0x4de   : > { %v2058_v63 = vadd.f32 -1.0, %v2213_v61  ;;  %v2215_v1 = vpop.eup %2214 }
 0x4df   : > { %v2059_v6 = vadd.f32 -1.0, %v2215_v1 }
 0x4e1   : > { %v1411_v9 = vmul.f32 1.6732632, %v2059_v6 }
 0x4e3   : > { %v1413_v14 = vsel %vm1403_vm2, %v1401_v57, %v1411_v9 }
 0x4e4   : > { %v1415_v15 = vmul.f32 1.050701, %v1413_v14 }
 0x50f   : > { %v1634_v13 = vpop.f32.mrf.mxu0  ;;  %v1703_v27 = vpop.f32.mrf.mxu1 }
 0x517   : > { %v1637_v19 = vpop.f32.mrf.mxu0  ;;  %v1706_v29 = vpop.f32.mrf.mxu1 }
 0x51f   : > { %v1640_v22 = vpop.f32.mrf.mxu0  ;;  %v1709_v21 = vpop.f32.mrf.mxu1 }
 0x527   : > { %v1643_v23 = vpop.f32.mrf.mxu0  ;;  %v1712_v4 = vpop.f32.mrf.mxu1 }
 0x52f   : > { %v1646_v26 = vpop.f32.mrf.mxu0  ;;  %v1715_v43 = vpop.f32.mrf.mxu1 }
 0x537   : > { %v1666_v12 = vpop.f32.mrf.mxu0 }
 0x538   : > { %v1681_v55 = vmax.f32 %v1634_v13, %v1666_v12 }
 0x53a   : > { %v1718_v10 = vmax.f32 %v1681_v55, %v1703_v27 }
 0x53f   : > { %v1669_v30 = vpop.f32.mrf.mxu0 }
 0x540   : > { %v1682_v53 = vmax.f32 %v1637_v19, %v1669_v30 }
 0x542   : > { %v1719_v58 = vmax.f32 %v1682_v53, %v1706_v29 }
 0x547   : > { %v1672_v32 = vpop.f32.mrf.mxu0 }
 0x548   : > { %v1683_v48 = vmax.f32 %v1640_v22, %v1672_v32 }
 0x54a   : > { %v1720_v56 = vmax.f32 %v1683_v48, %v1709_v21 }
 0x54f   : > { %v1675_v24 = vpop.f32.mrf.mxu0 }
 0x550   : > { %v1684_v46 = vmax.f32 %v1643_v23, %v1675_v24 }
 0x552   : > { %v1721_v54 = vmax.f32 %v1684_v46, %v1712_v4 }
 0x557   : > { %v1678_v31 = vpop.f32.mrf.mxu0 }
 0x558   : > { %v1685_v47 = vmax.f32 %v1646_v26, %v1678_v31 }
 0x55a   : > { %v1722_v49 = vmax.f32 %v1685_v47, %v1715_v43 }
 0x55c   : > { %2124 = vmatpush.msk.msra.mxu2 %vm522_vm0, %v1722_v49  ;;  %2127 = vmatpush.msk.msra.mxu3 %vm522_vm0, %v1722_v49 }
 0x55d   : > { %2130 = vmatpush.msk.msra.mxu0 %vm522_vm0, %v1722_v49  ;;  %vm1402_vm0 = vcmp.gt.f32.partialorder %v1400_v39, 0.0 }
 0x55e   : > { %1738 = vmatpush.msra.mxu2 %v1721_v54  ;;  %1761 = vmatpush.msra.mxu3 %v1721_v54 }
 0x55f   : > { %1786 = vmatpush.msra.mxu0 %v1721_v54 }
 0x560   : > { %1739 = vmatpush.msra.mxu2 %v1720_v56  ;;  %1762 = vmatpush.msra.mxu3 %v1720_v56 }
 0x561   : > { %1787 = vmatpush.msra.mxu0 %v1720_v56 }
 0x562   : > { %1740 = vmatpush.msra.mxu2 %v1719_v58  ;;  %1763 = vmatpush.msra.mxu3 %v1719_v58 }
 0x563   : > { %1788 = vmatpush.msra.mxu0 %v1719_v58 }
 0x564   : > { %1741 = vmatpush.msra.mxu2 %v1718_v10  ;;  %1764 = vmatpush.msra.mxu3 %v1718_v10 }
 0x565   : > { %1789 = vmatpush.msra.mxu0 %v1718_v10  ;;  %2125 = vmatmul.msk.f32.vlgmr.msra.gmra.mxu2 %vm488_vm1, %v2637_v3  ;;  %v1410_v3 = vmul.f32 1.6732632, %v2058_v63 }
 0x566   : > { %2128 = vmatmul.msk.f32.vlgmr.msra.gmra.mxu3 %vm488_vm1, %v2632_v2  ;;  %2131 = vmatmul.msk.f32.vlgmr.msra.gmra.mxu0 %vm488_vm1, %v2738_v50  ;;  %v1801_v2 = vld [vmem:[%s2920_s13] sm:$0xff] }
 0x567   : > { %1823 = vmatpush.msrb.mxu2 %v1804_v60  ;;  %v1412_v50 = vsel %vm1402_vm0, %v1400_v39, %v1410_v3 }
 0x568   : > { %v1414_v7 = vmul.f32 1.050701, %v1412_v50 }
 0x569   : > { %1824 = vmatpush.msrb.mxu2 %v1803_v62 }
 0x56b   : > { %1825 = vmatpush.msrb.mxu2 %v1802_v0 }
 0x56d   : > { %2126 = vmatmul.msk.f32.gmra.mxu2 %vm488_vm1, %v2645_v5  ;;  %v1800_v5 = vld [vmem:[%s2919_s12 + $0x8] sm:$0xff] }
 0x56e   : > { %2129 = vmatmul.msk.f32.gmra.mxu3 %vm488_vm1, %v2662_v8  ;;  %1826 = vmatpush.msrb.mxu2 %v1801_v2  ;;  %v1799_v8 = vld [vmem:[%s2919_s12] sm:$0xff] }
 0x56f   : > { %2132 = vmatmul.msk.f32.gmra.mxu0 %vm488_vm1, %v2748_v51  ;;  %1855 = vmatpush.msrb.mxu3 %v1800_v5  ;;  %vm1834_vm1 = vcmask 130048  }
 0x571   : > { %1856 = vmatpush.msrb.mxu3 %v1799_v8 }
 0x575   : > { %2133 = vmatmul.msk.f32.vlgmr.msrb.gmra.mxu2 %vm946_vm13, %v1414_v7 }
 0x57d   : > { %2134 = vmatmul.msk.f32.gmra.mxu2 %vm946_vm13, %v1415_v15 }
 0x5e3   : > { %v1791_v51 = vpop.f32.mrf.mxu0 }
 0x5e8   : > { %v1743_v16 = vpop.f32.mrf.mxu2 }
 0x5e9   : > { %v1766_v17 = vpop.f32.mrf.mxu3 }
 0x5ea   : > { %v1772_v18 = vmax.f32 %v1743_v16, %v1766_v17 }
 0x5ec   : > { %v1797_v20 = vmax.f32 %v1772_v18, %v1791_v51  ;;  %v1794_v35 = vpop.f32.mrf.mxu0 }
 0x5ee   : > { %2135 = vmatmul.msk.f32.vlgmr.msrb.gmra.mxu3 %vm1834_vm1, %v1797_v20 }
 0x5f0   : > { %v1746_v33 = vpop.f32.mrf.mxu2 }
 0x5f1   : > { %v1769_v34 = vpop.f32.mrf.mxu3 }
 0x5f2   : > { %v1773_v36 = vmax.f32 %v1746_v33, %v1769_v34 }
 0x5f4   : > { %v1798_v37 = vmax.f32 %v1773_v36, %v1794_v35 }
 0x5f6   : > { %2136 = vmatmul.msk.f32.gmra.mxu3 %vm1834_vm1, %v1798_v37 }
 0x5f8   : > { %v1828_v38 = vpop.f32.mrf.mxu2 }
 0x600   : > { %v1831_v42 = vpop.f32.mrf.mxu2 }
 0x671   : > { %v1858_v40 = vpop.f32.mrf.mxu3 }
 0x672   : > { %v1859_v41 = vadd.f32 %v1858_v40, %v1828_v38 }
 0x674   : > { %1865 = vst.msk [vmem:[%s467_s18] sm:$0xff] %vm1864_vm6, %v1859_v41 }
 0x679   : > { %v1861_v44 = vpop.f32.mrf.mxu3 }
 0x67a   : > { %v1862_v45 = vadd.f32 %v1861_v44, %v1831_v42 }
 0x67c   : > { %1866 = vst.msk [vmem:[%s467_s18 + $0x8] sm:$0xff] %vm1864_vm6, %v1862_v45 }
 0x67d PF: > { %s24_s29 = sadd.s32 1, %s2233_s29  }
 0x67e   : > { %p21_p4 = scmp.ge.s32.totalorder %s24_s29, 4  }
 0x680   :  { %23 = sbr.rel (!%p21_p4) target bundleno = 1 (0x1), region = 116 }

</bundles_post_ra>
